<compile_context>
chip_gen: v6e
topology: v6e:2x2x1
jax: 0.10.0
libtpu: 0.0.40
codegen_flags: <defaults>
</compile_context>

<pallas_src>
import functools

import jax
import jax.numpy as jnp
from jax import lax
from jax.experimental import pallas as pl
from jax.experimental.pallas import tpu as pltpu


def _multibox_stats_kernel(pconst_ref, boxes_ref, payload_ref, ploc_ref, pscore_ref,
                           stats_ref, *, threshold, neg_pos_ratio, n_search_iters):
    f32 = jnp.float32
    pc = pconst_ref[...]                  # (16, P) prior constants
    boxes = boxes_ref[0, 0]               # (M, 4)  xyxy, objects on sublanes
    payload = payload_ref[0, 0]           # (8, M)  rows: x0, y0, x1, y1, label, 0, 0, 0
    ploc = ploc_ref[0, 0]                 # (4, P)
    pscore = pscore_ref[0, 0]             # (2, P)

    M = boxes.shape[0]
    P = pc.shape[1]

    # ---------------- Jaccard overlap: (M objects) x (P priors) ----------------
    bx0 = boxes[:, 0:1]; by0 = boxes[:, 1:2]
    bx1 = boxes[:, 2:3]; by1 = boxes[:, 3:4]                    # (M, 1)
    px0 = pc[0:1, :]; py0 = pc[1:2, :]
    px1 = pc[2:3, :]; py1 = pc[3:4, :]                          # (1, P)
    area_p = pc[4:5, :]                                         # (1, P) hoisted

    ix = jnp.maximum(jnp.minimum(bx1, px1) - jnp.maximum(bx0, px0), 0.0)   # (M, P)
    iy = jnp.maximum(jnp.minimum(by1, py1) - jnp.maximum(by0, py0), 0.0)
    inter = ix * iy
    area_b = (bx1 - bx0) * (by1 - by0)                          # (M, 1)
    union = jnp.maximum(area_b + area_p - inter, 1e-10)         # guard zero-area dummies
    overlap = inter / union                                     # (M, P)

    iota_obj = lax.broadcasted_iota(jnp.int32, (M, P), 0)
    iota_pri = lax.broadcasted_iota(jnp.int32, (M, P), 1)

    # max over objects -> per-prior best object
    ov_max_obj = jnp.max(overlap, axis=0, keepdims=True)                        # (1, P)
    obj_for_prior = jnp.min(
        jnp.where(overlap == ov_max_obj, iota_obj, M), axis=0, keepdims=True)   # (1, P)
    # max over priors -> per-object best prior
    ov_max_pri = jnp.max(overlap, axis=1, keepdims=True)                        # (M, 1)
    prior_for_obj = jnp.min(
        jnp.where(overlap == ov_max_pri, iota_pri, P), axis=1, keepdims=True)   # (M, 1)

    # best-prior override: priors that are some object's best prior get that object + overlap 1.0
    match = (iota_pri == prior_for_obj)
    winner = jnp.max(jnp.where(match, iota_obj, -1), axis=0, keepdims=True)     # (1, P)
    has_winner = winner >= 0
    obj_for_prior = jnp.where(has_winner, winner, obj_for_prior)
    ov_for_prior = jnp.where(has_winner, 1.0, ov_max_obj)                       # (1, P)

    # ---------------- gather assigned label/box via ONE MXU matmul ----------------
    onehot = (iota_obj == obj_for_prior).astype(f32)                            # (M, P)
    gathered = jnp.dot(payload, onehot,
                       preferred_element_type=f32,
                       precision=lax.Precision.HIGHEST)                         # (8, P)
    label_for_prior = jnp.where(ov_for_prior < threshold, 0.0, gathered[4:5, :])
    pos = (label_for_prior != 0.0).astype(f32)                                  # (1, P)
    n_pos = jnp.sum(pos, axis=1, keepdims=True)                                 # (1, 1)

    # ---------------- gcxgcy encoding + masked L1, sublane-stacked (2, P) ----------------
    g_lo = gathered[0:2, :]                        # gx0, gy0
    g_hi = gathered[2:4, :]                        # gx1, gy1
    center = (g_lo + g_hi) * 0.5                   # gcx, gcy
    size = jnp.maximum(g_hi - g_lo, 1e-12)         # gw, gh  (clamp BEFORE log: dummy boxes safe)
    pcxy = pc[5:7, :]; inv_pwh10 = pc[7:9, :]; log_pwh = pc[9:11, :]
    t_xy = (center - pcxy) * inv_pwh10             # (2, P)
    t_wh = (jnp.log(size) - log_pwh) * 5.0         # (2, P)
    d = jnp.abs(ploc[0:2, :] - t_xy) + jnp.abs(ploc[2:4, :] - t_wh)             # (2, P)
    d_row = jnp.sum(d, axis=0, keepdims=True)                                   # (1, P)
    loc_abs_sum = jnp.sum(d_row * pos, axis=1, keepdims=True)                   # (1, 1)

    # ---------------- per-prior binary cross-entropy (2-term logsumexp) ----------------
    l0 = pscore[0:1, :]; l1 = pscore[1:2, :]
    lse = jnp.maximum(l0, l1) + jnp.log(1.0 + jnp.exp(-jnp.abs(l1 - l0)))
    picked = jnp.where(pos > 0.0, l1, l0)
    ce = lse - picked                                                           # (1, P), >= 0
    conf_pos_sum = jnp.sum(ce * pos, axis=1, keepdims=True)                     # (1, 1)

    # ---------------- hard-negative mining: sum of top-(3*n_pos) negatives ----------------
    # CE >= 0 and positives are zeroed, so only the SUM of the k largest values is needed.
    # Binary-search the k-th-largest value tau (O(iters*P) instead of O(P^2) ranks), then
    # sum everything strictly above tau and add the tie correction (k - count_gt) * tau.
    v = ce * (1.0 - pos)                                                        # (1, P)
    k = jnp.minimum(float(neg_pos_ratio) * n_pos, float(P))                     # (1, 1)
    v_max = jnp.max(v, axis=1, keepdims=True)                                   # (1, 1)

    def _search(_, carry):
        lo, hi = carry
        mid = 0.5 * (lo + hi)
        cnt = jnp.sum((v >= mid).astype(f32), axis=1, keepdims=True)
        go_up = cnt >= k                 # still >= k values above mid -> threshold is higher
        return jnp.where(go_up, mid, lo), jnp.where(go_up, hi, mid)

    tau, _ = lax.fori_loop(0, n_search_iters, _search,
                           (jnp.zeros_like(v_max), v_max + 1.0))
    gt = (v > tau).astype(f32)
    cnt_gt = jnp.sum(gt, axis=1, keepdims=True)
    sum_gt = jnp.sum(v * gt, axis=1, keepdims=True)
    conf_hardneg_sum = jnp.where(k > 0.0, sum_gt + (k - cnt_gt) * tau, 0.0)     # (1, 1)

    # ---------------- accumulate the 4 per-class sums over the batch axis ----------------
    row_idx = lax.broadcasted_iota(jnp.int32, (8, 128), 0)
    contrib = (jnp.where(row_idx == 0, n_pos, 0.0)
               + jnp.where(row_idx == 1, loc_abs_sum, 0.0)
               + jnp.where(row_idx == 2, conf_pos_sum, 0.0)
               + jnp.where(row_idx == 3, conf_hardneg_sum, 0.0))

    @pl.when(pl.program_id(1) == 0)
    def _():
        stats_ref[...] = jnp.zeros_like(stats_ref)

    stats_ref[0, :, :] += contrib


def multibox_loss(priors_cxcy, predicted_locs, predicted_scores, boxes, labels,
                  threshold=0.5, neg_pos_ratio=3, alpha=1.0):
    """predicted_locs: (N,C,P,4), predicted_scores: (N,C,P,2),
       boxes: (N,C,M,4) xyxy, labels: (N,C,M,1) int, priors_cxcy: (P,4)."""
    N, C, P, _ = predicted_locs.shape
    M = boxes.shape[2]
    assert P % 128 == 0 and M % 8 == 0, "pad priors/objects to (128, 8) multiples host-side"
    # TODO(synk): for production P=8732, pad to 8832 with inert dummy priors (zero area,
    #             forced negatives) so the lane axis stays 128-aligned.

    f32 = jnp.float32
    priors_cxcy = priors_cxcy.astype(f32)
    pcx, pcy = priors_cxcy[:, 0], priors_cxcy[:, 1]
    pw, ph = priors_cxcy[:, 2], priors_cxcy[:, 3]
    px0, py0 = pcx - pw / 2.0, pcy - ph / 2.0
    px1, py1 = pcx + pw / 2.0, pcy + ph / 2.0
    area_p = (px1 - px0) * (py1 - py0)

    # grid-invariant per-prior constants, hoisted out of the kernel (fetched once).
    prior_const = jnp.concatenate([
        jnp.stack([px0, py0, px1, py1, area_p, pcx, pcy,
                   10.0 / pw, 10.0 / ph, jnp.log(pw), jnp.log(ph)], axis=0),
        jnp.zeros((5, P), f32)], axis=0)                                   # (16, P)

    # gather payload: rows [x0, y0, x1, y1, label, 0, 0, 0] over the M objects (MXU LHS).
    payload = jnp.concatenate([
        jnp.transpose(boxes.astype(f32), (0, 1, 3, 2)),                    # (N, C, 4, M)
        jnp.transpose(labels.astype(f32), (0, 1, 3, 2)),                   # (N, C, 1, M)
        jnp.zeros((N, C, 3, M), f32)], axis=2)                             # (N, C, 8, M)

    ploc_t = jnp.transpose(predicted_locs.astype(f32), (0, 1, 3, 2))       # (N, C, 4, P)
    pscore_t = jnp.transpose(predicted_scores.astype(f32), (0, 1, 3, 2))   # (N, C, 2, P)

    kernel = functools.partial(_multibox_stats_kernel,
                               threshold=float(threshold),
                               neg_pos_ratio=int(neg_pos_ratio),
                               n_search_iters=40)

    stats = pl.pallas_call(
        kernel,
        out_shape=jax.ShapeDtypeStruct((C, 8, 128), jnp.float32),
        grid=(C, N),   # batch axis last: reduced in-kernel into the resident output block
        in_specs=[
            pl.BlockSpec((16, P), lambda c, i: (0, 0)),                    # prior constants
            pl.BlockSpec((1, 1, M, 4), lambda c, i: (i, c, 0, 0)),         # boxes (xyxy)
            pl.BlockSpec((1, 1, 8, M), lambda c, i: (i, c, 0, 0)),         # gather payload
            pl.BlockSpec((1, 1, 4, P), lambda c, i: (i, c, 0, 0)),         # predicted_locs
            pl.BlockSpec((1, 1, 2, P), lambda c, i: (i, c, 0, 0)),         # predicted_scores
        ],
        out_specs=pl.BlockSpec((1, 8, 128), lambda c, i: (c, 0, 0)),       # constant in i
        compiler_params=pltpu.CompilerParams(
            dimension_semantics=("parallel", "arbitrary")),
    )(prior_const, boxes.astype(f32), payload, ploc_t, pscore_t)

    # ---- tiny per-class combine (glue); the N-sum already happened in-kernel ----
    s = stats[:, 0:4, 0]                           # (C, 4): n_pos, loc_abs, conf_pos, conf_hardneg
    n_pos_c, loc_c, cpos_c, chn_c = s[:, 0], s[:, 1], s[:, 2], s[:, 3]
    denom = jnp.maximum(n_pos_c, 1.0)
    loc_loss_c = loc_c / (4.0 * denom)             # nn.L1Loss: mean over (n_pos * 4) elements
    conf_loss_c = cpos_c + chn_c
    contrib = (1.0 / C) * (conf_loss_c + alpha * loc_loss_c) / denom
    return jnp.sum(jnp.where(n_pos_c > 0.0, contrib, 0.0))


if __name__ == "__main__":
    key = jax.random.PRNGKey(0)
    N, C, P, M = 2, 4, 256, 8          # batch, n_classes, n_priors, objects per (image, class)
    k1, k2, k3, k4, k5, k6 = jax.random.split(key, 6)

    # priors in cxcywh, roughly inside the unit square
    prior_c = jax.random.uniform(k1, (P, 2), minval=0.05, maxval=0.95)
    prior_wh = jax.random.uniform(k2, (P, 2), minval=0.05, maxval=0.4)
    priors_cxcy = jnp.concatenate([prior_c, prior_wh], axis=1).astype(jnp.float32)

    # ground-truth boxes (xyxy, positive area) and labels (all "1" = object of that class)
    box_c = jax.random.uniform(k3, (N, C, M, 2), minval=0.2, maxval=0.8)
    box_wh = jax.random.uniform(k4, (N, C, M, 2), minval=0.05, maxval=0.3)
    boxes = jnp.concatenate([box_c - box_wh / 2.0, box_c + box_wh / 2.0], axis=-1).astype(jnp.float32)
    labels = jnp.ones((N, C, M, 1), dtype=jnp.int32)

    predicted_locs = jax.random.normal(k5, (N, C, P, 4), dtype=jnp.float32)
    predicted_scores = jax.random.normal(k6, (N, C, P, 2), dtype=jnp.float32)

    loss = multibox_loss(priors_cxcy, predicted_locs, predicted_scores, boxes, labels,
                         threshold=0.5, neg_pos_ratio=3, alpha=1.0)
    loss = jax.block_until_ready(loss)
    assert bool(jnp.isfinite(loss))
    print("KERNEL_OK")
</pallas_src>

<mosaic_0001>
module attributes {stable_mosaic.version = 11 : i64} {
  func.func @_multibox_stats_kernel(%arg0: i32, %arg1: i32, %arg2: memref<16x256xf32, #tpu.memory_space<vmem>>, %arg3: memref<1x1x8x4xf32, #tpu.memory_space<vmem>>, %arg4: memref<1x1x8x8xf32, #tpu.memory_space<vmem>>, %arg5: memref<1x1x4x256xf32, #tpu.memory_space<vmem>>, %arg6: memref<1x1x2x256xf32, #tpu.memory_space<vmem>>, %arg7: memref<1x8x128xf32, #tpu.memory_space<vmem>>) attributes {dimension_semantics = [#tpu.dimension_semantics<parallel>, #tpu.dimension_semantics<arbitrary>], iteration_bounds = array<i64: 4, 2>, scalar_prefetch = 0 : i64, scratch_operands = 0 : i64, tpu.core_type = #tpu.core_type<tc>, window_params = [{pipeline_mode = #tpu.pipeline_mode<synchronous>, transform_indices = @transform_0, window_bounds = array<i64: 16, 256>}, {transform_indices = @transform_1, window_bounds = array<i64: 1, 1, 8, 4>}, {transform_indices = @transform_2, window_bounds = array<i64: 1, 1, 8, 8>}, {transform_indices = @transform_3, window_bounds = array<i64: 1, 1, 4, 256>}, {transform_indices = @transform_4, window_bounds = array<i64: 1, 1, 2, 256>}, {transform_indices = @transform_5, window_bounds = array<i64: 1, 8, 128>}]} {
    %c0 = arith.constant 0 : index
    %c0_0 = arith.constant 0 : index
    %0 = vector.load %arg2[%c0, %c0_0] : memref<16x256xf32, #tpu.memory_space<vmem>>, vector<16x256xf32>
    %c0_1 = arith.constant 0 : index
    %c0_2 = arith.constant 0 : index
    %c0_3 = arith.constant 0 : index
    %c0_4 = arith.constant 0 : index
    %1 = vector.load %arg3[%c0_1, %c0_2, %c0_3, %c0_4] : memref<1x1x8x4xf32, #tpu.memory_space<vmem>>, vector<1x1x8x4xf32>
    %2 = vector.shape_cast %1 : vector<1x1x8x4xf32> to vector<8x4xf32>
    %c0_5 = arith.constant 0 : index
    %c0_6 = arith.constant 0 : index
    %c0_7 = arith.constant 0 : index
    %c0_8 = arith.constant 0 : index
    %3 = vector.load %arg4[%c0_5, %c0_6, %c0_7, %c0_8] : memref<1x1x8x8xf32, #tpu.memory_space<vmem>>, vector<1x1x8x8xf32>
    %4 = vector.shape_cast %3 : vector<1x1x8x8xf32> to vector<8x8xf32>
    %c0_9 = arith.constant 0 : index
    %c0_10 = arith.constant 0 : index
    %c0_11 = arith.constant 0 : index
    %c0_12 = arith.constant 0 : index
    %5 = vector.load %arg5[%c0_9, %c0_10, %c0_11, %c0_12] : memref<1x1x4x256xf32, #tpu.memory_space<vmem>>, vector<1x1x4x256xf32>
    %6 = vector.shape_cast %5 : vector<1x1x4x256xf32> to vector<4x256xf32>
    %c0_13 = arith.constant 0 : index
    %c0_14 = arith.constant 0 : index
    %c0_15 = arith.constant 0 : index
    %c0_16 = arith.constant 0 : index
    %7 = vector.load %arg6[%c0_13, %c0_14, %c0_15, %c0_16] : memref<1x1x2x256xf32, #tpu.memory_space<vmem>>, vector<1x1x2x256xf32>
    %8 = vector.shape_cast %7 : vector<1x1x2x256xf32> to vector<2x256xf32>
    %9 = vector.extract_strided_slice %2 {offsets = [0, 0], sizes = [8, 1], strides = [1, 1]} : vector<8x4xf32> to vector<8x1xf32>
    %10 = vector.extract_strided_slice %2 {offsets = [0, 1], sizes = [8, 1], strides = [1, 1]} : vector<8x4xf32> to vector<8x1xf32>
    %11 = vector.extract_strided_slice %2 {offsets = [0, 2], sizes = [8, 1], strides = [1, 1]} : vector<8x4xf32> to vector<8x1xf32>
    %12 = vector.extract_strided_slice %2 {offsets = [0, 3], sizes = [8, 1], strides = [1, 1]} : vector<8x4xf32> to vector<8x1xf32>
    %13 = vector.extract_strided_slice %0 {offsets = [0, 0], sizes = [1, 256], strides = [1, 1]} : vector<16x256xf32> to vector<1x256xf32>
    %14 = vector.extract_strided_slice %0 {offsets = [1, 0], sizes = [1, 256], strides = [1, 1]} : vector<16x256xf32> to vector<1x256xf32>
    %15 = vector.extract_strided_slice %0 {offsets = [2, 0], sizes = [1, 256], strides = [1, 1]} : vector<16x256xf32> to vector<1x256xf32>
    %16 = vector.extract_strided_slice %0 {offsets = [3, 0], sizes = [1, 256], strides = [1, 1]} : vector<16x256xf32> to vector<1x256xf32>
    %17 = vector.extract_strided_slice %0 {offsets = [4, 0], sizes = [1, 256], strides = [1, 1]} : vector<16x256xf32> to vector<1x256xf32>
    %18 = vector.broadcast %11 : vector<8x1xf32> to vector<8x256xf32>
    %19 = vector.broadcast %15 : vector<1x256xf32> to vector<8x256xf32>
    %20 = arith.minimumf %18, %19 : vector<8x256xf32>
    %21 = vector.broadcast %9 : vector<8x1xf32> to vector<8x256xf32>
    %22 = vector.broadcast %13 : vector<1x256xf32> to vector<8x256xf32>
    %23 = arith.maximumf %21, %22 : vector<8x256xf32>
    %24 = arith.subf %20, %23 : vector<8x256xf32>
    %cst = arith.constant 0.000000e+00 : f32
    %25 = vector.broadcast %cst : f32 to vector<8x256xf32>
    %26 = arith.maximumf %24, %25 : vector<8x256xf32>
    %27 = vector.broadcast %12 : vector<8x1xf32> to vector<8x256xf32>
    %28 = vector.broadcast %16 : vector<1x256xf32> to vector<8x256xf32>
    %29 = arith.minimumf %27, %28 : vector<8x256xf32>
    %30 = vector.broadcast %10 : vector<8x1xf32> to vector<8x256xf32>
    %31 = vector.broadcast %14 : vector<1x256xf32> to vector<8x256xf32>
    %32 = arith.maximumf %30, %31 : vector<8x256xf32>
    %33 = arith.subf %29, %32 : vector<8x256xf32>
    %cst_17 = arith.constant 0.000000e+00 : f32
    %34 = vector.broadcast %cst_17 : f32 to vector<8x256xf32>
    %35 = arith.maximumf %33, %34 : vector<8x256xf32>
    %36 = arith.mulf %26, %35 : vector<8x256xf32>
    %37 = arith.subf %11, %9 : vector<8x1xf32>
    %38 = arith.subf %12, %10 : vector<8x1xf32>
    %39 = arith.mulf %37, %38 : vector<8x1xf32>
    %40 = vector.broadcast %39 : vector<8x1xf32> to vector<8x256xf32>
    %41 = vector.broadcast %17 : vector<1x256xf32> to vector<8x256xf32>
    %42 = arith.addf %40, %41 : vector<8x256xf32>
    %43 = arith.subf %42, %36 : vector<8x256xf32>
    %cst_18 = arith.constant 1.000000e-10 : f32
    %44 = vector.broadcast %cst_18 : f32 to vector<8x256xf32>
    %45 = arith.maximumf %43, %44 : vector<8x256xf32>
    %46 = arith.divf %36, %45 : vector<8x256xf32>
    %47 = tpu.iota {dimensions = array<i32: 0>} : vector<8x256xi32>
    %48 = tpu.iota {dimensions = array<i32: 1>} : vector<8x256xi32>
    %cst_19 = arith.constant dense<0xFF800000> : vector<256xf32>
    %49 = vector.multi_reduction <maximumf>, %46, %cst_19 [0] : vector<8x256xf32> to vector<256xf32>
    %50 = vector.shape_cast %49 : vector<256xf32> to vector<1x256xf32>
    %51 = vector.broadcast %50 : vector<1x256xf32> to vector<8x256xf32>
    %52 = arith.cmpf oeq, %46, %51 : vector<8x256xf32>
    %c8_i32 = arith.constant 8 : i32
    %53 = vector.broadcast %c8_i32 : i32 to vector<8x256xi32>
    %54 = arith.select %52, %47, %53 : vector<8x256xi1>, vector<8x256xi32>
    %cst_20 = arith.constant dense<2147483647> : vector<256xi32>
    %55 = vector.multi_reduction <minsi>, %54, %cst_20 [0] : vector<8x256xi32> to vector<256xi32>
    %56 = vector.shape_cast %55 : vector<256xi32> to vector<1x256xi32>
    %cst_21 = arith.constant dense<0xFF800000> : vector<8xf32>
    %57 = vector.multi_reduction <maximumf>, %46, %cst_21 [1] : vector<8x256xf32> to vector<8xf32>
    %58 = vector.shape_cast %57 : vector<8xf32> to vector<8x1xf32>
    %59 = vector.broadcast %58 : vector<8x1xf32> to vector<8x256xf32>
    %60 = arith.cmpf oeq, %46, %59 : vector<8x256xf32>
    %c256_i32 = arith.constant 256 : i32
    %61 = vector.broadcast %c256_i32 : i32 to vector<8x256xi32>
    %62 = arith.select %60, %48, %61 : vector<8x256xi1>, vector<8x256xi32>
    %cst_22 = arith.constant dense<2147483647> : vector<8xi32>
    %63 = vector.multi_reduction <minsi>, %62, %cst_22 [1] : vector<8x256xi32> to vector<8xi32>
    %64 = vector.shape_cast %63 : vector<8xi32> to vector<8x1xi32>
    %65 = vector.broadcast %64 : vector<8x1xi32> to vector<8x256xi32>
    %66 = arith.cmpi eq, %48, %65 : vector<8x256xi32>
    %c-1_i32 = arith.constant -1 : i32
    %67 = vector.broadcast %c-1_i32 : i32 to vector<8x256xi32>
    %68 = arith.select %66, %47, %67 : vector<8x256xi1>, vector<8x256xi32>
    %cst_23 = arith.constant dense<-2147483648> : vector<256xi32>
    %69 = vector.multi_reduction <maxsi>, %68, %cst_23 [0] : vector<8x256xi32> to vector<256xi32>
    %70 = vector.shape_cast %69 : vector<256xi32> to vector<1x256xi32>
    %c0_i32 = arith.constant 0 : i32
    %71 = vector.broadcast %c0_i32 : i32 to vector<1x256xi32>
    %72 = arith.cmpi sge, %70, %71 : vector<1x256xi32>
    %73 = arith.select %72, %70, %56 : vector<1x256xi1>, vector<1x256xi32>
    %cst_24 = arith.constant 1.000000e+00 : f32
    %74 = vector.broadcast %cst_24 : f32 to vector<1x256xf32>
    %75 = arith.select %72, %74, %50 : vector<1x256xi1>, vector<1x256xf32>
    %76 = vector.broadcast %73 : vector<1x256xi32> to vector<8x256xi32>
    %77 = arith.cmpi eq, %47, %76 : vector<8x256xi32>
    %78 = arith.extui %77 : vector<8x256xi1> to vector<8x256xi32>
    %79 = arith.sitofp %78 : vector<8x256xi32> to vector<8x256xf32>
    %cst_25 = arith.constant dense<0.000000e+00> : vector<8x256xf32>
    %80 = tpu.matmul %4, %79, %cst_25 {dimension_numbers = #tpu.dot_dimension_numbers<[1], [0], [0], [1], [0, 0, 1, 1], [], []>, precision = #tpu.contract_precision<fp32>} : vector<8x8xf32>, vector<8x256xf32>, vector<8x256xf32> -> vector<8x256xf32>
    %cst_26 = arith.constant 5.000000e-01 : f32
    %81 = vector.broadcast %cst_26 : f32 to vector<1x256xf32>
    %82 = arith.cmpf olt, %75, %81 : vector<1x256xf32>
    %83 = vector.extract_strided_slice %80 {offsets = [4, 0], sizes = [1, 256], strides = [1, 1]} : vector<8x256xf32> to vector<1x256xf32>
    %cst_27 = arith.constant 0.000000e+00 : f32
    %84 = vector.broadcast %cst_27 : f32 to vector<1x256xf32>
    %85 = arith.select %82, %84, %83 : vector<1x256xi1>, vector<1x256xf32>
    %cst_28 = arith.constant 0.000000e+00 : f32
    %86 = vector.broadcast %cst_28 : f32 to vector<1x256xf32>
    %87 = arith.cmpf one, %85, %86 : vector<1x256xf32>
    %88 = arith.extui %87 : vector<1x256xi1> to vector<1x256xi32>
    %89 = arith.sitofp %88 : vector<1x256xi32> to vector<1x256xf32>
    %cst_29 = arith.constant dense<0.000000e+00> : vector<1xf32>
    %90 = vector.multi_reduction <add>, %89, %cst_29 [1] : vector<1x256xf32> to vector<1xf32>
    %91 = vector.shape_cast %90 : vector<1xf32> to vector<1x1xf32>
    %92 = vector.extract_strided_slice %80 {offsets = [0, 0], sizes = [2, 256], strides = [1, 1]} : vector<8x256xf32> to vector<2x256xf32>
    %93 = vector.extract_strided_slice %80 {offsets = [2, 0], sizes = [2, 256], strides = [1, 1]} : vector<8x256xf32> to vector<2x256xf32>
    %94 = arith.addf %92, %93 : vector<2x256xf32>
    %cst_30 = arith.constant 5.000000e-01 : f32
    %95 = vector.broadcast %cst_30 : f32 to vector<2x256xf32>
    %96 = arith.mulf %94, %95 : vector<2x256xf32>
    %97 = arith.subf %93, %92 : vector<2x256xf32>
    %cst_31 = arith.constant 9.99999996E-13 : f32
    %98 = vector.broadcast %cst_31 : f32 to vector<2x256xf32>
    %99 = arith.maximumf %97, %98 : vector<2x256xf32>
    %100 = vector.extract_strided_slice %0 {offsets = [5, 0], sizes = [2, 256], strides = [1, 1]} : vector<16x256xf32> to vector<2x256xf32>
    %101 = vector.extract_strided_slice %0 {offsets = [7, 0], sizes = [2, 256], strides = [1, 1]} : vector<16x256xf32> to vector<2x256xf32>
    %102 = vector.extract_strided_slice %0 {offsets = [9, 0], sizes = [2, 256], strides = [1, 1]} : vector<16x256xf32> to vector<2x256xf32>
    %103 = arith.subf %96, %100 : vector<2x256xf32>
    %104 = arith.mulf %103, %101 : vector<2x256xf32>
    %105 = math.log %99 : vector<2x256xf32>
    %106 = arith.subf %105, %102 : vector<2x256xf32>
    %cst_32 = arith.constant 5.000000e+00 : f32
    %107 = vector.broadcast %cst_32 : f32 to vector<2x256xf32>
    %108 = arith.mulf %106, %107 : vector<2x256xf32>
    %109 = vector.extract_strided_slice %6 {offsets = [0, 0], sizes = [2, 256], strides = [1, 1]} : vector<4x256xf32> to vector<2x256xf32>
    %110 = arith.subf %109, %104 : vector<2x256xf32>
    %111 = math.absf %110 : vector<2x256xf32>
    %112 = vector.extract_strided_slice %6 {offsets = [2, 0], sizes = [2, 256], strides = [1, 1]} : vector<4x256xf32> to vector<2x256xf32>
    %113 = arith.subf %112, %108 : vector<2x256xf32>
    %114 = math.absf %113 : vector<2x256xf32>
    %115 = arith.addf %111, %114 : vector<2x256xf32>
    %cst_33 = arith.constant dense<0.000000e+00> : vector<256xf32>
    %116 = vector.multi_reduction <add>, %115, %cst_33 [0] : vector<2x256xf32> to vector<256xf32>
    %117 = vector.shape_cast %116 : vector<256xf32> to vector<1x256xf32>
    %118 = arith.mulf %117, %89 : vector<1x256xf32>
    %cst_34 = arith.constant dense<0.000000e+00> : vector<1xf32>
    %119 = vector.multi_reduction <add>, %118, %cst_34 [1] : vector<1x256xf32> to vector<1xf32>
    %120 = vector.shape_cast %119 : vector<1xf32> to vector<1x1xf32>
    %121 = vector.extract_strided_slice %8 {offsets = [0, 0], sizes = [1, 256], strides = [1, 1]} : vector<2x256xf32> to vector<1x256xf32>
    %122 = vector.extract_strided_slice %8 {offsets = [1, 0], sizes = [1, 256], strides = [1, 1]} : vector<2x256xf32> to vector<1x256xf32>
    %123 = arith.maximumf %121, %122 : vector<1x256xf32>
    %124 = arith.subf %122, %121 : vector<1x256xf32>
    %125 = math.absf %124 : vector<1x256xf32>
    %cst_35 = arith.constant 0.000000e+00 : f32
    %126 = vector.broadcast %cst_35 : f32 to vector<1x256xf32>
    %127 = arith.subf %126, %125 : vector<1x256xf32>
    %128 = math.exp %127 : vector<1x256xf32>
    %cst_36 = arith.constant 1.000000e+00 : f32
    %129 = vector.broadcast %cst_36 : f32 to vector<1x256xf32>
    %130 = arith.addf %129, %128 : vector<1x256xf32>
    %131 = math.log %130 : vector<1x256xf32>
    %132 = arith.addf %123, %131 : vector<1x256xf32>
    %cst_37 = arith.constant 0.000000e+00 : f32
    %133 = vector.broadcast %cst_37 : f32 to vector<1x256xf32>
    %134 = arith.cmpf ogt, %89, %133 : vector<1x256xf32>
    %135 = arith.select %134, %122, %121 : vector<1x256xi1>, vector<1x256xf32>
    %136 = arith.subf %132, %135 : vector<1x256xf32>
    %137 = arith.mulf %136, %89 : vector<1x256xf32>
    %cst_38 = arith.constant dense<0.000000e+00> : vector<1xf32>
    %138 = vector.multi_reduction <add>, %137, %cst_38 [1] : vector<1x256xf32> to vector<1xf32>
    %139 = vector.shape_cast %138 : vector<1xf32> to vector<1x1xf32>
    %cst_39 = arith.constant 1.000000e+00 : f32
    %140 = vector.broadcast %cst_39 : f32 to vector<1x256xf32>
    %141 = arith.subf %140, %89 : vector<1x256xf32>
    %142 = arith.mulf %136, %141 : vector<1x256xf32>
    %cst_40 = arith.constant 3.000000e+00 : f32
    %143 = vector.broadcast %cst_40 : f32 to vector<1x1xf32>
    %144 = arith.mulf %143, %91 : vector<1x1xf32>
    %cst_41 = arith.constant 2.560000e+02 : f32
    %145 = vector.broadcast %cst_41 : f32 to vector<1x1xf32>
    %146 = arith.minimumf %144, %145 : vector<1x1xf32>
    %cst_42 = arith.constant dense<0xFF800000> : vector<1xf32>
    %147 = vector.multi_reduction <maximumf>, %142, %cst_42 [1] : vector<1x256xf32> to vector<1xf32>
    %148 = vector.shape_cast %147 : vector<1xf32> to vector<1x1xf32>
    %cst_43 = arith.constant 0.000000e+00 : f32
    %149 = vector.broadcast %cst_43 : f32 to vector<1x1xf32>
    %cst_44 = arith.constant 1.000000e+00 : f32
    %150 = vector.broadcast %cst_44 : f32 to vector<1x1xf32>
    %151 = arith.addf %148, %150 : vector<1x1xf32>
    %c0_i32_45 = arith.constant 0 : i32
    %c40_i32 = arith.constant 40 : i32
    %152 = arith.addi %c0_i32_45, %c40_i32 : i32
    %c1_i32 = arith.constant 1 : i32
    %153:2 = scf.for %arg8 = %c0_i32_45 to %152 step %c1_i32 iter_args(%arg9 = %149, %arg10 = %151) -> (vector<1x1xf32>, vector<1x1xf32>)  : i32 {
      %207 = arith.addf %arg9, %arg10 : vector<1x1xf32>
      %cst_64 = arith.constant 5.000000e-01 : f32
      %208 = vector.broadcast %cst_64 : f32 to vector<1x1xf32>
      %209 = arith.mulf %208, %207 : vector<1x1xf32>
      %210 = vector.broadcast %209 : vector<1x1xf32> to vector<1x256xf32>
      %211 = arith.cmpf oge, %142, %210 : vector<1x256xf32>
      %212 = arith.extui %211 : vector<1x256xi1> to vector<1x256xi32>
      %213 = arith.sitofp %212 : vector<1x256xi32> to vector<1x256xf32>
      %cst_65 = arith.constant dense<0.000000e+00> : vector<1xf32>
      %214 = vector.multi_reduction <add>, %213, %cst_65 [1] : vector<1x256xf32> to vector<1xf32>
      %215 = vector.shape_cast %214 : vector<1xf32> to vector<1x1xf32>
      %216 = arith.cmpf oge, %215, %146 : vector<1x1xf32>
      %217 = arith.select %216, %209, %arg9 : vector<1x1xi1>, vector<1x1xf32>
      %218 = arith.select %216, %arg10, %209 : vector<1x1xi1>, vector<1x1xf32>
      scf.yield %217, %218 : vector<1x1xf32>, vector<1x1xf32>
    }
    %154 = vector.broadcast %153#0 : vector<1x1xf32> to vector<1x256xf32>
    %155 = arith.cmpf ogt, %142, %154 : vector<1x256xf32>
    %156 = arith.extui %155 : vector<1x256xi1> to vector<1x256xi32>
    %157 = arith.sitofp %156 : vector<1x256xi32> to vector<1x256xf32>
    %cst_46 = arith.constant dense<0.000000e+00> : vector<1xf32>
    %158 = vector.multi_reduction <add>, %157, %cst_46 [1] : vector<1x256xf32> to vector<1xf32>
    %159 = vector.shape_cast %158 : vector<1xf32> to vector<1x1xf32>
    %160 = arith.mulf %142, %157 : vector<1x256xf32>
    %cst_47 = arith.constant dense<0.000000e+00> : vector<1xf32>
    %161 = vector.multi_reduction <add>, %160, %cst_47 [1] : vector<1x256xf32> to vector<1xf32>
    %162 = vector.shape_cast %161 : vector<1xf32> to vector<1x1xf32>
    %cst_48 = arith.constant 0.000000e+00 : f32
    %163 = vector.broadcast %cst_48 : f32 to vector<1x1xf32>
    %164 = arith.cmpf ogt, %146, %163 : vector<1x1xf32>
    %165 = arith.subf %146, %159 : vector<1x1xf32>
    %166 = arith.mulf %165, %153#0 : vector<1x1xf32>
    %167 = arith.addf %162, %166 : vector<1x1xf32>
    %cst_49 = arith.constant 0.000000e+00 : f32
    %168 = vector.broadcast %cst_49 : f32 to vector<1x1xf32>
    %169 = arith.select %164, %167, %168 : vector<1x1xi1>, vector<1x1xf32>
    %170 = tpu.iota {dimensions = array<i32: 0>} : vector<8x128xi32>
    %c0_i32_50 = arith.constant 0 : i32
    %171 = vector.broadcast %c0_i32_50 : i32 to vector<8x128xi32>
    %172 = arith.cmpi eq, %170, %171 : vector<8x128xi32>
    %cst_51 = arith.constant 0.000000e+00 : f32
    %173 = vector.shape_cast %91 : vector<1x1xf32> to vector<1x1xf32>
    %174 = vector.broadcast %173 : vector<1x1xf32> to vector<8x128xf32>
    %175 = vector.broadcast %cst_51 : f32 to vector<8x128xf32>
    %176 = arith.select %172, %174, %175 : vector<8x128xi1>, vector<8x128xf32>
    %c1_i32_52 = arith.constant 1 : i32
    %177 = vector.broadcast %c1_i32_52 : i32 to vector<8x128xi32>
    %178 = arith.cmpi eq, %170, %177 : vector<8x128xi32>
    %cst_53 = arith.constant 0.000000e+00 : f32
    %179 = vector.shape_cast %120 : vector<1x1xf32> to vector<1x1xf32>
    %180 = vector.broadcast %179 : vector<1x1xf32> to vector<8x128xf32>
    %181 = vector.broadcast %cst_53 : f32 to vector<8x128xf32>
    %182 = arith.select %178, %180, %181 : vector<8x128xi1>, vector<8x128xf32>
    %183 = arith.addf %176, %182 : vector<8x128xf32>
    %c2_i32 = arith.constant 2 : i32
    %184 = vector.broadcast %c2_i32 : i32 to vector<8x128xi32>
    %185 = arith.cmpi eq, %170, %184 : vector<8x128xi32>
    %cst_54 = arith.constant 0.000000e+00 : f32
    %186 = vector.shape_cast %139 : vector<1x1xf32> to vector<1x1xf32>
    %187 = vector.broadcast %186 : vector<1x1xf32> to vector<8x128xf32>
    %188 = vector.broadcast %cst_54 : f32 to vector<8x128xf32>
    %189 = arith.select %185, %187, %188 : vector<8x128xi1>, vector<8x128xf32>
    %190 = arith.addf %183, %189 : vector<8x128xf32>
    %c3_i32 = arith.constant 3 : i32
    %191 = vector.broadcast %c3_i32 : i32 to vector<8x128xi32>
    %192 = arith.cmpi eq, %170, %191 : vector<8x128xi32>
    %cst_55 = arith.constant 0.000000e+00 : f32
    %193 = vector.shape_cast %169 : vector<1x1xf32> to vector<1x1xf32>
    %194 = vector.broadcast %193 : vector<1x1xf32> to vector<8x128xf32>
    %195 = vector.broadcast %cst_55 : f32 to vector<8x128xf32>
    %196 = arith.select %192, %194, %195 : vector<8x128xi1>, vector<8x128xf32>
    %197 = arith.addf %190, %196 : vector<8x128xf32>
    %c0_i32_56 = arith.constant 0 : i32
    %198 = arith.cmpi eq, %arg1, %c0_i32_56 : i32
    %199 = arith.extui %198 : i1 to i32
    %c0_i32_57 = arith.constant 0 : i32
    %200 = arith.cmpi ne, %199, %c0_i32_57 : i32
    scf.if %200 {
      %cst_64 = arith.constant 0.000000e+00 : f32
      %207 = vector.broadcast %cst_64 : f32 to vector<1x8x128xf32>
      %c0_65 = arith.constant 0 : index
      %c0_66 = arith.constant 0 : index
      %c0_67 = arith.constant 0 : index
      %208 = vector.load %arg7[%c0_65, %c0_66, %c0_67] : memref<1x8x128xf32, #tpu.memory_space<vmem>>, vector<1x8x128xf32>
      tpu.vector_store %arg7[%c0_65, %c0_66, %c0_67], %207 {strides = array<i32>} : memref<1x8x128xf32, #tpu.memory_space<vmem>>, vector<1x8x128xf32>,
    } else {
    }
    %c0_58 = arith.constant 0 : index
    %c0_59 = arith.constant 0 : index
    %c0_60 = arith.constant 0 : index
    %201 = vector.load %arg7[%c0_58, %c0_59, %c0_60] : memref<1x8x128xf32, #tpu.memory_space<vmem>>, vector<1x8x128xf32>
    %202 = vector.shape_cast %201 : vector<1x8x128xf32> to vector<8x128xf32>
    %203 = arith.addf %202, %197 : vector<8x128xf32>
    %c0_61 = arith.constant 0 : index
    %c0_62 = arith.constant 0 : index
    %c0_63 = arith.constant 0 : index
    %204 = vector.load %arg7[%c0_61, %c0_62, %c0_63] : memref<1x8x128xf32, #tpu.memory_space<vmem>>, vector<1x8x128xf32>
    %205 = vector.shape_cast %204 : vector<1x8x128xf32> to vector<8x128xf32>
    %206 = vector.shape_cast %203 : vector<8x128xf32> to vector<1x8x128xf32>
    tpu.vector_store %arg7[%c0_61, %c0_62, %c0_63], %206 {strides = array<i32>} : memref<1x8x128xf32, #tpu.memory_space<vmem>>, vector<1x8x128xf32>,
    return
  }
  func.func @transform_0(%arg0: i32, %arg1: i32) -> (i32, i32) {
    %c0_i32 = arith.constant 0 : i32
    %c0_i32_0 = arith.constant 0 : i32
    %c0_i32_1 = arith.constant 0 : i32
    return %c0_i32, %c0_i32_0 : i32, i32
  }
  func.func @transform_1(%arg0: i32, %arg1: i32) -> (i32, i32, i32, i32) {
    %c0_i32 = arith.constant 0 : i32
    %c0_i32_0 = arith.constant 0 : i32
    %c0_i32_1 = arith.constant 0 : i32
    return %arg1, %arg0, %c0_i32, %c0_i32_0 : i32, i32, i32, i32
  }
  func.func @transform_2(%arg0: i32, %arg1: i32) -> (i32, i32, i32, i32) {
    %c0_i32 = arith.constant 0 : i32
    %c0_i32_0 = arith.constant 0 : i32
    %c0_i32_1 = arith.constant 0 : i32
    return %arg1, %arg0, %c0_i32, %c0_i32_0 : i32, i32, i32, i32
  }
  func.func @transform_3(%arg0: i32, %arg1: i32) -> (i32, i32, i32, i32) {
    %c0_i32 = arith.constant 0 : i32
    %c0_i32_0 = arith.constant 0 : i32
    %c0_i32_1 = arith.constant 0 : i32
    return %arg1, %arg0, %c0_i32, %c0_i32_0 : i32, i32, i32, i32
  }
  func.func @transform_4(%arg0: i32, %arg1: i32) -> (i32, i32, i32, i32) {
    %c0_i32 = arith.constant 0 : i32
    %c0_i32_0 = arith.constant 0 : i32
    %c0_i32_1 = arith.constant 0 : i32
    return %arg1, %arg0, %c0_i32, %c0_i32_0 : i32, i32, i32, i32
  }
  func.func @transform_5(%arg0: i32, %arg1: i32) -> (i32, i32, i32) {
    %c0_i32 = arith.constant 0 : i32
    %c0_i32_0 = arith.constant 0 : i32
    %c0_i32_1 = arith.constant 0 : i32
    return %arg0, %c0_i32, %c0_i32_0 : i32, i32, i32
  }
}

</mosaic_0001>

<bundles_post_ra>
// kernel: tpu_custom_call.1
= control target key start
LH: loop header
LB: loop body
LE: loop exit
PB: predicated region body
PF: predicated region fallthrough
CT: control target
= control target key end

     0   :  { %s2495_s0 = inlined_call_operand.vmem [shape: f32[16,256], index: 0, kind: input, shape index: {}]   ;;  %s2496_s1 = inlined_call_operand.vmem [shape: f32[2,4,8,4], index: 1, kind: input, shape index: {}]   ;;  %s2497_s2 = inlined_call_operand.vmem [shape: f32[2,4,8,8], index: 2, kind: input, shape index: {}]   ;;  %s2498_s3 = inlined_call_operand.hbm [shape: f32[2,4,4,256], index: 3, kind: input, shape index: {}]   ;;  %s2499_s4 = inlined_call_operand.hbm [shape: f32[2,4,2,256], index: 4, kind: input, shape index: {}]   ;;  %s2500_s5 = inlined_call_operand.hbm [shape: f32[4,8,128], index: 5, kind: output, shape index: {}]  }
   0x1   :  { %2506 = sst [smem:[#allocation18_spill]] %s2498_s3 }
   0x2   :  { %10 = vsyncpa [#allocation3], 0 }
   0x3   :  { %12 = vsyncpa [#allocation3 + $0x1], 0 }
   0x4   :  { %13 = vsyncpa [#allocation6], 0 }
   0x5   :  { %15 = vsyncpa [#allocation6 + $0x1], 0 }
   0x6   :  { %16 = vsyncpa [#allocation4], 0 }
   0x7   :  { %18 = vsyncpa [#allocation4 + $0x1], 0  ;;  %s2031_s18 = smov 0   ;;  %s2033_s19 = smov 0  }
   0x8   :  { %s2035_s20 = smov 0   ;;  %s2037_s21 = smov 0  }
   0x9   :  { %s2039_s22 = smov 0   ;;  %s2041_s23 = smov 0  }
   0xa   :  { %s2043_s24 = smov 0   ;;  %s2045_s25 = smov 0  }
   0xb   :  { %s2047_s26 = smov 0   ;;  %s2049_s27 = smov 0  }
   0xc   :  { %s2051_s28 = smov 0  }
   0xd LB: > { %2507 = sst [smem:[#allocation11_spill]] %s1951_s23  ;;  %s1574_s29 = sadd.s32 4294967295, %s1971_s28   ;;  %s1971_s28 = sphi %s2051_s28, %s24_s28   ;;  %s1967_s27 = sphi %s2049_s27, %s2533_s27   ;;  %s1963_s26 = sphi %s2047_s26, %s2526_s26   ;;  %s1959_s25 = sphi %s2045_s25, %s2525_s25   ;;  %s1955_s24 = sphi %s2043_s24, %s2524_s24   ;;  %s1951_s23 = sphi %s2041_s23, %s2523_s23   ;;  %s1947_s22 = sphi %s2039_s22, %s2532_s22   ;;  %s1943_s21 = sphi %s2037_s21, %s2531_s21   ;;  %s1939_s20 = sphi %s2035_s20, %s2530_s20   ;;  %s1935_s19 = sphi %s2033_s19, %s2529_s19   ;;  %s1931_s18 = sphi %s2031_s18, %s2528_s18  }
   0xe   : > { %2508 = sst [smem:[#allocation12_spill]] %s1963_s26  ;;  %s1575_s30 = sadd.s32 4294967294, %s1971_s28  }
   0xf   : > { %2509 = sst [smem:[#allocation13_spill]] %s1967_s27  ;;  %s33_s6 = sadd.s32 1, %s1963_s26 }
  0x10   : > { %s36_s7 = sadd.s32 1, %s1967_s27  ;;  %p34_p0 = scmp.ge.s32.totalorder %s33_s6, 2 }
  0x11   : > { %s122_s8 = sadd.s32 1, %s1951_s23  ;;  %p129_p1 = scmp.ne.s32.totalorder %s1951_s23, %s1947_s22 }
  0x12   : > { %p130_p2 = scmp.eq.s32.totalorder %s1971_s28, 0  ;;  %s2535_s6 = smov (%p34_p0, %s33_s6), 0 }
  0x13   : > { %2510 = sst [smem:[#allocation14_spill]] %s2535_s6  ;;  %s2537_s7 = smov (!%p34_p0, %s36_s7), %s1967_s27 }
  0x14   : > { %s117_s9 = ssub.s32 %s1963_s26, %s2535_s6  ;;  %p2097_p3 = por %p130_p2, %p129_p1 }
  0x15   : > { %p38_p4 = scmp.ge.s32.totalorder %s2537_s7, 4  ;;  %p135_p5 = scmp.ne.s32.totalorder %s1947_s22, %s1943_s21 }
  0x16   : > { %p136_p6 = scmp.eq.s32.totalorder %s1574_s29, 0  ;;  %s176_s11 = sadd.s32 1, %s1939_s20 }
  0x17   : > { %s2539_s7 = smov (%p38_p4, %s2537_s7), 0  ;;  %p186_p8 = scmp.ne.s32.totalorder %s1939_s20, %s1935_s19 }
  0x18   : > { %2512 = sst [smem:[#allocation15_spill]] %s2539_s7  ;;  %p2105_p7 = por %p136_p6, %p135_p5 }
  0x19   : > { %s118_s13 = ssub.s32 %s1967_s27, %s2539_s7  ;;  %p187_p9 = scmp.eq.s32.totalorder %s1574_s29, 7 }
  0x1a   : > { %s119_s14 = sor.u32 %s118_s13, %s117_s9  ;;  %p174_p10 = scmp.eq.s32.totalorder %s118_s13, 0 }
  0x1b   : > { %p120_p11 = scmp.eq.s32.totalorder %s119_s14, 0  ;;  %p2113_p12 = por %p187_p9, %p186_p8 }
  0x1c   : > { %s2118_s16 = scalar_select %p174_p10, %s1939_s20, %s176_s11  }
  0x1d   : > { %s2121_s17 = scalar_select %p120_p11, %s1951_s23, %s122_s8  }
  0x1e   : > { %2515 = sst [smem:[#allocation16_spill]] %s2118_s16  ;;  %p192_p13 = scmp.ne.s32.totalorder %s1935_s19, %s1931_s18 }
  0x1f   : > { %2516 = sst [smem:[#allocation17_spill]] %s2121_s17  ;;  %p193_p0 = scmp.eq.s32.totalorder %s1575_s30, 7 }
  0x20   : > { %p1632_p1 = scmp.lt.s32.totalorder %s1971_s28, 8  ;;  %s2131_s29 = sand.u32 1, %s1951_s23  }
  0x21   : > { %p2126_p2 = por %p193_p0, %p192_p13  ;;  %s1578_s9 = sshll.u32 %s2131_s29, 3 }
  0x22   : > { %s1579_s13 = sshll.u32 %s1967_s27, 1  ;;  %s1580_s14 = sshll.u32 %s1963_s26, 3 }
  0x23   : > { %s242_s11 = scalar_lea.vmem [#allocation2], %s1578_s9  ;;  %s248_s8 = sadd.s32 %s1580_s14, %s1579_s13 }
  0x24   : > { %s252_s7 = sshll.u32 %s242_s11, 4  ;;  %s1581_s6 = sshll.u32 %s248_s8, 6  ;;  %s253_s7 = int_to_ptr.vmem [resolvable:$true] %s252_s7 }
  0x25   : > { %p2138_p4 = pnand %p1632_p1, %p2097_p3  ;;  %s2519_s3 = sld [smem:[#allocation18_spill]] }
  0x26   : > { %p1586_p5 = scmp.ge.s32.totalorder %s1971_s28, 1  ;;  %p278_p6 = scmp.lt.s32.totalorder %s1971_s28, 9 }
  0x27   : > { %s239_s27 = scalar_lea.sflag [#allocation3], %s2131_s29  ;;  %p1781_p8 = pneg %p2138_p4 }
  0x28   : > { %s1792_s9 = scalar_lea.vmem %s253_s7, 128  ;;  %s1985_s10 = smov [#allocation2]  }
  0x29   : > { %p1793_p9 = scmp.ne.s32.totalorder %s253_s7, %s1792_s9  ;;  %s1797_s13 = sshll.u32 %s1985_s10, 4  ;;  %s1798_s13 = int_to_ptr.vmem [resolvable:$false] %s1797_s13 }
  0x2a   : > { %s1799_s14 = scalar_lea.vmem %s1798_s13, 256  ;;  %p1800_p11 = scmp.lt.s32.totalorder %s253_s7, %s1798_s13 }
  0x2b   : > { %s250_s23 = scalar_lea.hbm %s2519_s3, %s1581_s6  ;;  %p1795_p10 = pnand %p1793_p9, %p1781_p8 }
  0x2c   : > { %p1801_p13 = scmp.lt.s32.totalorder %s1799_s14, %s1792_s9 }
  0x2d   : > { %p1796_p3 = pneg %p1795_p10 }
  0x2e   : > { %p1802_p0 = por %p1801_p13, %p1800_p11 }
  0x30   : > { %p1803_p1 = pnand %p1802_p0, %p1796_p3 }
  0x32   : > { %1806 = shalt.err (!%p1803_p1)
}
  0x33   : > { %1624 = dma.hbm_to_vmem [thread:$0]  (!%p2138_p4), %s250_s23, 128, %s253_s7, %s239_s27  }
  0x34   : > { %p2159_p9 = pnand %p1586_p5, %p278_p6  ;;  %s1582_s16 = sshll.u32 %s2131_s29, 2 }
  0x35   : > { %s1585_s17 = sshll.u32 %s248_s8, 5  ;;  %s263_s13 = scalar_lea.vmem [#allocation5], %s1582_s16 }
  0x36   : > { %s271_s10 = scalar_lea.hbm %s2499_s4, %s1585_s17  ;;  %s273_s14 = sshll.u32 %s263_s13, 4  ;;  %s274_s14 = int_to_ptr.vmem [resolvable:$true] %s273_s14 }
  0x37   : > { %s260_s3 = scalar_lea.sflag [#allocation6], %s2131_s29  ;;  %s1820_s26 = scalar_lea.vmem %s274_s14, 64 }
  0x38   : > { %p1821_p10 = scmp.ne.s32.totalorder %s274_s14, %s1820_s26  ;;  %s1986_s23 = smov [#allocation5]  }
  0x39   : > { %s1825_s27 = sshll.u32 %s1986_s23, 4  ;;  %s1826_s27 = int_to_ptr.vmem [resolvable:$false] %s1825_s27 }
  0x3a   : > { %p1823_p3 = pnand %p1821_p10, %p1781_p8  ;;  %s1827_s7 = scalar_lea.vmem %s1826_s27, 128 }
  0x3b   : > { %p1828_p5 = scmp.lt.s32.totalorder %s274_s14, %s1826_s27  ;;  %p1829_p6 = scmp.lt.s32.totalorder %s1827_s7, %s1820_s26 }
  0x3c   : > { %p1824_p11 = pneg %p1823_p3 }
  0x3d   : > { %p1830_p13 = por %p1829_p6, %p1828_p5 }
  0x3f   : > { %p1831_p0 = pnand %p1830_p13, %p1824_p11 }
  0x41   : > { %1834 = shalt.err (!%p1831_p0)
}
  0x42   : > { %1627 = dma.hbm_to_vmem [thread:$0]  (!%p2138_p4), %s271_s10, 64, %s274_s14, %s260_s3  }
  0x43   : > { %282 = sbr.rel (%p2159_p9) target bundleno = 1964 (0x7ac), region = 40  ;;  %s284_s29 = sand.u32 (!%p2159_p9), 1, %s1947_s22  }
  0x44   : > { %s1587_s8 = sshll.u32 (!%p2159_p9), %s284_s29, 3  ;;  %s285_s16 = scalar_lea.sflag (!%p2159_p9), [#allocation3], %s284_s29 }
  0x45   : > { %s2176_s17 = scalar_lea.vmem (!%p2159_p9), [#allocation2], %s1587_s8 }
  0x48   : > { %1918 = dma.done.wait (%p2105_p7), %s285_s16, 128  }
  0x49   : > { %1920 = vsyncadd (%p2105_p7), %s285_s16, 4294967168  ;;  %s1588_s26 = sshll.u32 %s284_s29, 2  ;;  %s294_s11 = scalar_lea.sflag [#allocation6], %s284_s29 }
  0x4a   : > { %s2182_s30 = scalar_lea.vmem [#allocation5], %s1588_s26 }
  0x4b   : > { %1922 = dma.done.wait (%p2105_p7), %s294_s11, 64  }
  0x4c   : > { %1924 = vsyncadd (%p2105_p7), %s294_s11, 4294967232  ;;  %p345_p4 = scmp.lt.s32.totalorder %s1955_s24, 1  ;;  %p347_p8 = scmp.lt.s32.totalorder %s1959_s25, 3  ;;  %v1987_v0 = vmov 2   ;;  %v1988_v1 = vmov 3   ;;  %v1990_v3 = vmov 0   ;;  %v374_v9 = vlaneseq }
  0x4d   : > { %1759 = vset.pattern.permute.xlu1 %v1987_v0  ;;  %1761 = vset.pattern.permute.xlu0 %v1988_v1  ;;  %s1989_s27 = smov 2   ;;  %v1991_v4 = vmov 1   ;;  %s1992_s7 = smov 127   ;;  %v2212_v15 = vld [vmem:[%s2495_s0] sm:$0xff]  ;;  %v2217_v16 = vld [vmem:[%s2495_s0 + $0x8] sm:$0xff]  ;;  %vm564_vm8 = vcmask 64512  }
  0x4e   : > { %s346_s3 = scalar_select %p345_p4, %s1955_s24, 1  ;;  %v2201_v11 = vshrl.u32 %v374_v9, 7  ;;  %v471_v62 = vand.u32 127, %v374_v9  ;;  %v1993_v9 = vmov 0.0  }
  0x4f   : > { %s348_s6 = scalar_select %p347_p8, %s1959_s25, 3  ;;  %634 = vmatprep.mubr.f32.mxu0 %v1993_v9  ;;  %720 = vmatprep.mubr.f32.mxu1 %v1993_v9 }
  0x50   : > { %s1590_s9 = sshll.u32 %s346_s3, 2  ;;  %v2204_v12 = vsub.s32 2, %v2201_v11  ;;  %v2207_v13 = vsub.s32 0, %v2201_v11  ;;  %v2220_v17 = vsub.s32 1, %v2201_v11  ;;  %v2223_v18 = vsub.s32 3, %v2201_v11  ;;  %s342_s11 = sand.u32 1, %s1935_s19  }
  0x51   : > { %s2192_s10 = sadd.s32 %s1590_s9, %s348_s6  ;;  %v2242_v41 = vsub.s32 4, %v2201_v11  ;;  %v472_v63 = vadd.s32 128, %v471_v62  ;;  %s2251_s3 = sshll.u32 %s342_s11, 3 }
  0x52   : > { %s1591_s13 = sshll.u32 %s2192_s10, 3  ;;  %v377_v19 = vrot.slane %v2212_v15, %v2204_v12  ;;  %v381_v20 = vrot.slane %v2217_v16, %v2204_v12  ;;  %v391_v21 = vrot.slane %v2212_v15, %v2207_v13  ;;  %v395_v22 = vrot.slane %v2217_v16, %v2207_v13 }
  0x53   : > { %s352_s23 = scalar_lea.vmem %s2496_s1, %s1591_s13  ;;  %v423_v23 = vrot.slane %v2212_v15, %v2220_v17  ;;  %v427_v24 = vrot.slane %v2217_v16, %v2220_v17  ;;  %v409_v25 = vrot.slane %v2212_v15, %v2223_v18  ;;  %v413_v26 = vrot.slane %v2217_v16, %v2223_v18  ;;  %s360_s12 = scalar_lea.vmem %s2497_s2, %s1591_s13 }
  0x54   : > { %v365_v2 = vld [vmem:[%s352_s23] sm:$0xff]  ;;  %v453_v46 = vrot.slane %v2212_v15, %v2242_v41  ;;  %v457_v47 = vrot.slane %v2217_v16, %v2242_v41  ;;  %s2390_s23 = smov 0  }
  0x55   : > { %436 = vrot.lane.b32.xlu0 %v365_v2, %s1989_s27  ;;  %371 = vperm.xlu1 %1759, %v365_v2  }
  0x59   : > { %1760 = vset.pattern.permute.xlu1 %v1990_v3 }
  0x5a   : > { %385 = vperm.xlu1 %1760, %v365_v2  }
  0x5e   : > { %1762 = vset.pattern.permute.xlu1 %v1991_v4 }
  0x5f   : > { %417 = vperm.xlu1 %1762, %v365_v2  }
  0x63   : > { %1763 = vset.pattern.permute.xlu1 %v1987_v0 }
  0xc7   : > { %v437_v5 = vpop.permute.xlu0 %436 }
  0xc8   : > { %v439_v6 = vsub.f32 %v365_v2, %v437_v5 }
  0xca   : > { %441 = vrot.lane.b32.xlu0 %v439_v6, %s1992_s7 }
  0xce   : > { %403 = vperm.xlu0 %1761, %v365_v2  }
  0xd0   : > { %v372_v10 = vpop.permute.xlu1 %371 }
  0xd1   : > { %v382_v29 = vmin.f32 %v372_v10, %v377_v19  ;;  %v383_v30 = vmin.f32 %v372_v10, %v381_v20 }
  0xd2   : > { %1764 = vset.pattern.permute.xlu0 %v1987_v0 }
  0xd5   : > { %v386_v14 = vpop.permute.xlu1 %385 }
  0xd6   : > { %v396_v31 = vmax.f32 %v386_v14, %v391_v21  ;;  %v397_v32 = vmax.f32 %v386_v14, %v395_v22 }
  0xd8   : > { %v398_v37 = vsub.f32 %v382_v29, %v396_v31  ;;  %v399_v38 = vsub.f32 %v383_v30, %v397_v32 }
  0xda   : > { %v418_v27 = vpop.permute.xlu1 %417  ;;  %v400_v42 = vmax.f32 %v398_v37, 0.0  ;;  %v401_v43 = vmax.f32 %v399_v38, 0.0  ;;  %v366_v37 = vld [vmem:[%s360_s12] sm:$0xff] }
  0xdb   : > { %v428_v33 = vmax.f32 %v418_v27, %v423_v23  ;;  %v429_v34 = vmax.f32 %v418_v27, %v427_v24 }
 0x13c   : > { %v442_v7 = vpop.permute.xlu0 %441 }
 0x13d   : > { %v444_v8 = vmul.f32 %v442_v7, %v439_v6 }
 0x13f   : > { %447 = vperm.xlu1 %1763, %v444_v8  }
 0x149   : > { %v404_v28 = vpop.permute.xlu0 %403 }
 0x14a   : > { %v414_v35 = vmin.f32 %v404_v28, %v409_v25  ;;  %v415_v36 = vmin.f32 %v404_v28, %v413_v26 }
 0x14c   : > { %v430_v39 = vsub.f32 %v414_v35, %v428_v33  ;;  %v431_v40 = vsub.f32 %v415_v36, %v429_v34 }
 0x14e   : > { %v432_v44 = vmax.f32 %v430_v39, 0.0  ;;  %v433_v45 = vmax.f32 %v431_v40, 0.0 }
 0x150   : > { %v434_v49 = vmul.f32 %v432_v44, %v400_v42  ;;  %v435_v50 = vmul.f32 %v433_v45, %v401_v43  ;;  %v566_v44 = vsel %vm564_vm8, %v366_v37, 0 }
 0x1ba   : > { %v448_v48 = vpop.permute.xlu1 %447 }
 0x1bb   : > { %v458_v51 = vadd.f32 %v453_v46, %v448_v48  ;;  %v459_v52 = vadd.f32 %v457_v47, %v448_v48  ;;  %v2268_v47 = vand.u32 4294901760, %v566_v44 }
 0x1bd   : > { %v460_v53 = vsub.f32 %v458_v51, %v434_v49  ;;  %v461_v54 = vsub.f32 %v459_v52, %v435_v50 }
 0x1bf   : > { %v462_v55 = vmax.f32 %v460_v53, 1e-10  ;;  %v463_v56 = vmax.f32 %v461_v54, 1e-10  ;;  %v636_v53 = vsub.f32 %v566_v44, %v2268_v47 }
 0x1c1   : > { %1765 = vrcp.f32 %v462_v55 }
 0x1c2   : > { %1767 = vrcp.f32 %v463_v56 }
 0x1ce   : > { %v1766_v57 = vpop.eup %1765 }
 0x1cf   : > { %v1768_v58 = vpop.eup %1767  ;;  %v465_v59 = vmul.f32 %v1766_v57, %v434_v49 }
 0x1d0   : > { %v467_v60 = vmul.f32 %v1768_v58, %v435_v50 }
 0x1d1   : > { %v473_v19 = vrot.slane %v465_v59, 4 }
 0x1d2   : > { %v507_v61 = vmax.f32 %v465_v59, %v467_v60  ;;  %v479_v20 = vrot.slane %v467_v60, 4 }
 0x1d3   : > { %v474_v21 = vmax.f32 %v465_v59, %v473_v19  ;;  %v1994_v19 = vmov 1.0  }
 0x1d4   : > { %508 = vmax.xlane.f32.xlu0 %v507_v61  ;;  %v480_v22 = vmax.f32 %v467_v60, %v479_v20  ;;  %v637_v61 = vand.u32 4294901760, %v636_v53 }
 0x1d5   : > { %v475_v23 = vrot.slane %v474_v21, 2 }
 0x1d6   : > { %v481_v24 = vrot.slane %v480_v22, 2 }
 0x1d7   : > { %v476_v25 = vmax.f32 %v474_v21, %v475_v23 }
 0x1d8   : > { %v482_v26 = vmax.f32 %v480_v22, %v481_v24 }
 0x1d9   : > { %v477_v27 = vrot.slane %v476_v25, 1 }
 0x1da   : > { %v483_v28 = vrot.slane %v482_v26, 1 }
 0x1db   : > { %v2255_v29 = vmax.f32 %v476_v25, %v477_v27 }
 0x1dc   : > { %v2257_v30 = vmax.f32 %v482_v26, %v483_v28 }
 0x1dd   : > { %vm485_vm4 = vcmp.eq.f32.partialorder %v465_v59, %v2255_v29 }
 0x1de   : > { %vm486_vm5 = vcmp.eq.f32.partialorder %v467_v60, %v2257_v30  ;;  %v487_v31 = vsel %vm485_vm4, %v2201_v11, 8 }
 0x1df   : > { %v488_v32 = vsel %vm486_vm5, %v2201_v11, 8  ;;  %v489_v33 = vrot.slane %v487_v31, 4 }
 0x1e0   : > { %v498_v34 = vrot.slane %v488_v32, 4 }
 0x1e1   : > { %vm490_vm6 = vcmp.lt.s32.totalorder %v487_v31, %v489_v33 }
 0x1e2   : > { %vm499_vm7 = vcmp.lt.s32.totalorder %v488_v32, %v498_v34  ;;  %v491_v36 = vsel %vm490_vm6, %v487_v31, %v489_v33 }
 0x1e3   : > { %v500_v38 = vsel %vm499_vm7, %v488_v32, %v498_v34  ;;  %v492_v43 = vrot.slane %v491_v36, 2  ;;  %v2313_v32 = vld [vmem:[%s2182_s30] sm:$0xf] }
 0x1e4   : > { %v501_v45 = vrot.slane %v500_v38, 2  ;;  %v1141_v33 = vrot.slane %v2313_v32, 7 }
 0x1e5   : > { %vm493_vm11 = vcmp.lt.s32.totalorder %v491_v36, %v492_v43 }
 0x1e6   : > { %vm502_vm12 = vcmp.lt.s32.totalorder %v500_v38, %v501_v45  ;;  %v494_v52 = vsel %vm493_vm11, %v491_v36, %v492_v43  ;;  %v1146_v34 = vsub.f32 %v2313_v32, %v1141_v33 }
 0x1e7   : > { %v503_v54 = vsel %vm502_vm12, %v500_v38, %v501_v45  ;;  %vm1043_vm12 = vcmask 1044484  }
 0x25d   : > { %v509_v0 = vpop.xlane.xlu0 %508 }
 0x25e   : > { %vm510_vm0 = vcmp.eq.f32.partialorder %v465_v59, %v509_v0  ;;  %vm511_vm1 = vcmp.eq.f32.partialorder %v467_v60, %v509_v0  ;;  %v495_v59 = vrot.slane %v494_v52, 1  ;;  %v504_v60 = vrot.slane %v503_v54, 1 }
 0x25f   : > { %v512_v1 = vsel %vm510_vm0, %v471_v62, 256  ;;  %v513_v2 = vsel %vm511_vm1, %v472_v63, 256 }
 0x260   : > { %vm514_vm2 = vcmp.lt.s32.totalorder %v512_v1, %v513_v2  ;;  %vm496_vm1 = vcmp.lt.s32.totalorder %v494_v52, %v495_v59 }
 0x261   : > { %v515_v4 = vsel %vm514_vm2, %v512_v1, %v513_v2  ;;  %vm505_vm2 = vcmp.lt.s32.totalorder %v503_v54, %v504_v60  ;;  %v638_v2 = vsub.f32 %v636_v53, %v637_v61 }
 0x262   : > { %v517_v5 = vshra.s32 %v515_v4, 16  ;;  %v516_v7 = vand.u32 65535, %v515_v4 }
 0x264   : > { %v519_v6 = vcvt.s32.f32 %v517_v5  ;;  %v518_v10 = vcvt.s32.f32 %v516_v7  ;;  %v497_v5 = vsel %vm496_vm1, %v494_v52, %v495_v59  ;;  %v506_v7 = vsel %vm505_vm2, %v503_v54, %v504_v60 }
 0x265   : > { %vm1118_vm1 = vcmask 1041408  }
 0x266   : > { %520 = vmin.xlane.f32.xlu1 %v519_v6 }
 0x2ef   : > { %v521_v8 = vpop.xlane.xlu1 %520 }
 0x2f0   : > { %vm522_vm3 = vcmp.eq.f32.partialorder %v519_v6, %v521_v8  ;;  %v527_v35 = vcvt.f32.s32 %v521_v8 }
 0x2f1   : > { %v523_v14 = vsel %vm522_vm3, %v518_v10, inf }
 0x2f2   : > { %524 = vmin.xlane.f32.xlu0 %v523_v14  ;;  %v528_v40 = vshll.u32 %v527_v35, 16  ;;  %v639_v14 = vand.u32 4294901760, %v638_v2  ;;  %v1147_v35 = vand.u32 2147483647, %v1146_v34 }
 0x2f4   : > { %v1148_v36 = vsub.f32 0.0, %v1147_v35 }
 0x2f6   : > { %v1149_v37 = vmul.f32 1.442695, %v1148_v36 }
 0x2f8   : > { %1769 = vpow2.f32 %v1149_v37 }
 0x305   : > { %v1770_v38 = vpop.eup %1769 }
 0x37b   : > { %v525_v39 = vpop.xlane.xlu0 %524 }
 0x37c   : > { %v526_v42 = vcvt.f32.s32 %v525_v39 }
 0x37e   : > { %v529_v46 = vadd.s32 %v528_v40, %v526_v42  ;;  %v1151_v42 = vadd.f32 1.0, %v1770_v38 }
 0x380   : > { %vm530_vm9 = vcmp.eq.s32.totalorder %v471_v62, %v529_v46  ;;  %vm531_vm10 = vcmp.eq.s32.totalorder %v472_v63, %v529_v46  ;;  %1771 = vlog2.f32 %v1151_v42  ;;  %v364_v42 = vld [vmem:[%s2495_s0 + $0x18] sm:$0xff] }
 0x381   : > { %v532_v48 = vsel %vm530_vm9, %v2201_v11, 4294967295  ;;  %v533_v49 = vsel %vm531_vm10, %v2201_v11, 4294967295 }
 0x382   : > { %v534_v50 = vrot.slane %v532_v48, 4  ;;  %v543_v51 = vrot.slane %v533_v49, 4 }
 0x384   : > { %vm535_vm13 = vcmp.gt.s32.totalorder %v532_v48, %v534_v50  ;;  %vm544_vm14 = vcmp.gt.s32.totalorder %v533_v49, %v543_v51 }
 0x385   : > { %v536_v55 = vsel %vm535_vm13, %v532_v48, %v534_v50  ;;  %v545_v56 = vsel %vm544_vm14, %v533_v49, %v543_v51 }
 0x386   : > { %v537_v57 = vrot.slane %v536_v55, 2  ;;  %v546_v58 = vrot.slane %v545_v56, 2 }
 0x388   : > { %vm538_vm15 = vcmp.gt.s32.totalorder %v536_v55, %v537_v57  ;;  %vm547_vm0 = vcmp.gt.s32.totalorder %v545_v56, %v546_v58 }
 0x389   : > { %v548_v62 = vsel %vm547_vm0, %v545_v56, %v546_v58  ;;  %v539_v63 = vsel %vm538_vm15, %v536_v55, %v537_v57  ;;  %vm1077_vm0 = vcmask 1040384  }
 0x38a   : > { %v549_v0 = vrot.slane %v548_v62, 1  ;;  %v540_v1 = vrot.slane %v539_v63, 1 }
 0x38c   : > { %vm550_vm3 = vcmp.gt.s32.totalorder %v548_v62, %v549_v0  ;;  %vm541_vm4 = vcmp.gt.s32.totalorder %v539_v63, %v540_v1 }
 0x38d   : > { %v2273_v4 = vsel %vm550_vm3, %v548_v62, %v549_v0  ;;  %v2275_v6 = vsel %vm541_vm4, %v539_v63, %v540_v1  ;;  %v1772_v62 = vpop.eup %1771 }
 0x38e   : > { %vm553_vm5 = vcmp.ge.s32.totalorder %v2273_v4, 0  ;;  %vm552_vm6 = vcmp.ge.s32.totalorder %v2275_v6, 0 }
 0x38f   : > { %v555_v8 = vsel %vm553_vm5, %v2273_v4, %v506_v7  ;;  %v554_v10 = vsel %vm552_vm6, %v2275_v6, %v497_v5  ;;  %v556_v55 = vsel %vm552_vm6, 1.0, %v2255_v29  ;;  %v557_v63 = vsel %vm553_vm5, 1.0, %v2257_v30 }
 0x390   : > { %vm559_vm7 = vcmp.eq.s32.totalorder %v2201_v11, %v555_v8  ;;  %vm558_vm8 = vcmp.eq.s32.totalorder %v2201_v11, %v554_v10  ;;  %vm1033_vm9 = vcmp.lt.f32.partialorder %v556_v55, 0.5  ;;  %v1995_v7 = vmov 1983009808  }
 0x391   : > { %1596 = vmatprep.subr.msk.mxu0 %vm559_vm7, %v1994_v19  ;;  %v1594_v20 = vsel %vm558_vm8, 1.0, %v1993_v9  ;;  %v1595_v21 = vsel %vm559_vm7, 1.0, %v1993_v9  ;;  %v1187_v8 = vunpack.c.l.s4 %v1995_v7  ;;  %v1164_v29 = vrot.slane %v2313_v32, %v2220_v17 }
 0x392   : > { %1597 = vmatpush1.msk.msra.mxu0 %vm558_vm8, %v1994_v19  ;;  %v677_v22 = vsub.f32 %v1595_v21, %v1595_v21  ;;  %v683_v23 = vsub.f32 %v1594_v20, %v1594_v20  ;;  %v1168_v6 = vrot.slane %v2313_v32, %v2223_v18  ;;  %v1142_v10 = vrot.slane %v1141_v33, 2 }
 0x393   : > { %640 = vmatmul.mubr.f32.vlgmr.msra.gmra.mxu0 %v639_v14  ;;  %vm1034_vm11 = vcmp.lt.f32.partialorder %v557_v63, 0.5  ;;  %v1153_v4 = vmul.f32 0.6931472, %v1772_v62  ;;  %v1188_v17 = vunpack.c.0.s8 %v1187_v8  ;;  %v1078_v63 = vrot.slane %v2212_v15, 7 }
 0x394   : > { %760 = vmatprep.subr.mxu0 %v677_v22  ;;  %796 = vmatprep.mubr.f32.mxu0 %v1993_v9  ;;  %v678_v24 = vand.u32 4294901760, %v677_v22  ;;  %v684_v25 = vand.u32 4294901760, %v683_v23  ;;  %v1144_v18 = vmax.f32 %v2313_v32, %v1142_v10 }
 0x395   : > { %763 = vmatpush1.msra.mxu0 %v683_v23 }
 0x396   : > { %914 = vmatprep.subr.mxu0 %v678_v24  ;;  %v679_v26 = vsub.f32 %v677_v22, %v678_v24  ;;  %v685_v27 = vsub.f32 %v683_v23, %v684_v25  ;;  %v1174_v22 = vrot.slane %v2313_v32, %v2207_v13 }
 0x397   : > { %799 = vmatmul.mubr.f32.vlgmr.msra.gmra.mxu0 %v636_v53 }
 0x398   : > { %918 = vmatpush1.msra.mxu0 %v684_v25  ;;  %v680_v28 = vand.u32 4294901760, %v679_v26  ;;  %v686_v31 = vand.u32 4294901760, %v685_v27  ;;  %951 = vmatprep.mubr.f32.mxu0 %v1993_v9  ;;  %v1178_v25 = vrot.slane %v2313_v32, %v2204_v12 }
 0x39a   : > { %681 = vmatprep.subr.mxu1 %v680_v28  ;;  %v1605_v28 = vrot.slane %v1153_v4, 9 }
 0x39b   : > { %687 = vmatpush1.msra.mxu1 %v686_v31  ;;  %953 = vmatmul.mubr.f32.vlgmr.msra.gmra.mxu0 %v2268_v47 }
 0x39c   : > { %722 = vmatmul.mubr.f32.vlgmr.msra.gmra.mxu1 %v2268_v47  ;;  %1598 = vmatprep.subr.msk.mxu1 %vm559_vm7, %v1994_v19 }
 0x39d   : > { %1599 = vmatpush1.msk.msra.mxu1 %vm558_vm8, %v1994_v19  ;;  %871 = vmatprep.mubr.f32.mxu1 %v1993_v9 }
 0x39e   : > { %1600 = vmatprep.subr.msk.mxu1 %vm559_vm7, %v1994_v19 }
 0x3a0   : > { %875 = vmatmul.mubr.f32.vlgmr.msra.gmra.mxu1 %v637_v61 }
 0x3a1   : > { %1601 = vmatpush1.msk.msra.mxu1 %vm558_vm8, %v1994_v19  ;;  %1025 = vmatprep.mubr.f32.mxu1 %v1993_v9 }
 0x3a4   : > { %1027 = vmatmul.mubr.f32.vlgmr.msra.gmra.mxu1 %v2268_v47 }
 0x453   : > { %v641_v39 = vpop.f32.mrf.mxu0 }
 0x455   : > { %v643_v40 = vpop.f32.mrf.mxu0 }
 0x457   : > { %v800_v43 = vpop.f32.mrf.mxu0 }
 0x459   : > { %v802_v45 = vpop.f32.mrf.mxu0 }
 0x45b   : > { %v954_v51 = vpop.f32.mrf.mxu0 }
 0x45c   : > { %v723_v44 = vpop.f32.mrf.mxu1 }
 0x45d   : > { %v724_v46 = vadd.f32 %v723_v44, %v641_v39  ;;  %v956_v58 = vpop.f32.mrf.mxu0 }
 0x45e   : > { %v725_v47 = vpop.f32.mrf.mxu1 }
 0x45f   : > { %v801_v48 = vadd.f32 %v800_v43, %v724_v46  ;;  %v726_v49 = vadd.f32 %v725_v47, %v643_v40  ;;  %v1158_v43 = vadd.f32 %v1605_v28, %v1144_v18  ;;  %v367_v28 = vld [vmem:[%s2176_s17] sm:$0xff]  ;;  %s2388_s17 = scalar_lea.vmem [#allocation7], %s2251_s3 }
 0x460   : > { %v876_v50 = vpop.f32.mrf.mxu1 }
 0x461   : > { %v803_v52 = vadd.f32 %v802_v45, %v726_v49  ;;  %v877_v53 = vadd.f32 %v876_v50, %v801_v48  ;;  %v1191_v45 = vsub.s32 %v1188_v17, %v2201_v11  ;;  %v1070_v50 = vrot.slane %v2217_v16, 5 }
 0x462   : > { %v878_v54 = vpop.f32.mrf.mxu1 }
 0x463   : > { %v955_v56 = vadd.f32 %v954_v51, %v877_v53  ;;  %v879_v57 = vadd.f32 %v878_v54, %v803_v52  ;;  %v1082_v51 = vrot.slane %v364_v42, 7  ;;  %v1081_v52 = vrot.slane %v2217_v16, 7  ;;  %v363_v53 = vld [vmem:[%s2495_s0 + $0x10] sm:$0xff] }
 0x464   : > { %v1028_v59 = vpop.f32.mrf.mxu1 }
 0x465   : > { %v957_v60 = vadd.f32 %v956_v58, %v879_v57  ;;  %v1029_v61 = vadd.f32 %v1028_v59, %v955_v56  ;;  %v1069_v57 = vrot.slane %v2212_v15, 5  ;;  %v1083_v16 = vsel %vm1077_vm0, %v1081_v52, %v1082_v51 }
 0x466   : > { %v1030_v0 = vpop.f32.mrf.mxu1 }
 0x467   : > { %v1059_v1 = vrot.slane %v1029_v61, 6  ;;  %v1031_v2 = vadd.f32 %v1030_v0, %v957_v60  ;;  %v1035_v5 = vsel %vm1033_vm9, 0.0, %v1029_v61  ;;  %v1051_v26 = vrot.slane %v1029_v61, 2 }
 0x468   : > { %vm1037_vm10 = vcmp.ne.f32.partialorder %v1035_v5, 0.0 }
 0x469   : > { %v1063_v14 = vsub.f32 %v1029_v61, %v1059_v1  ;;  %v1060_v19 = vrot.slane %v1031_v2, 6  ;;  %v1052_v30 = vrot.slane %v1031_v2, 2  ;;  %v1036_v20 = vsel %vm1034_vm11, 0.0, %v1031_v2 }
 0x46a   : > { %v2328_v21 = vsel %vm1037_vm10, 1.0, %v1993_v9  ;;  %vm1038_vm13 = vcmp.ne.f32.partialorder %v1036_v20, 0.0  ;;  %v1055_v47 = vadd.f32 %v1051_v26, %v1029_v61  ;;  %v1079_v61 = vrot.slane %v363_v53, 7 }
 0x46b   : > { %v1065_v23 = vmax.f32 %v1063_v14, 1e-12  ;;  %v1064_v24 = vsub.f32 %v1031_v2, %v1060_v19  ;;  %vm1159_vm14 = vcmp.gt.f32.partialorder %v2328_v21, 0.0  ;;  %v1056_v31 = vadd.f32 %v1052_v30, %v1031_v2 }
 0x46c   : > { %v2337_v33 = vsel %vm1038_vm13, 1.0, %v1993_v9  ;;  %v1044_v34 = vsel %vm1043_vm12, %v2328_v21, 0.0  ;;  %v1181_v35 = vsel %vm1159_vm14, %v1164_v29, %v1174_v22  ;;  %v1223_v32 = vsub.f32 1.0, %v2328_v21 }
 0x46d   : > { %1773 = vlog2.f32 %v1065_v23  ;;  %v1066_v27 = vmax.f32 %v1064_v24, 1e-12  ;;  %v1045_v36 = vsel %vm1043_vm12, %v2337_v33, 0.0  ;;  %vm1160_vm15 = vcmp.gt.f32.partialorder %v2337_v33, 0.0 }
 0x46e   : > { %v1046_v37 = vadd.f32 %v1045_v36, %v1044_v34  ;;  %v1182_v38 = vsel %vm1160_vm15, %v1168_v6, %v1178_v25  ;;  %v1224_v39 = vsub.f32 1.0, %v2337_v33  ;;  %v1197_v40 = vcombine.high %v2328_v21, %v2337_v33 }
 0x46f   : > { %1775 = vlog2.f32 %v1066_v27  ;;  %v1185_v44 = vcombine.high %v1181_v35, %v1182_v38  ;;  %v1058_v49 = vmul.f32 0.5, %v1056_v31  ;;  %v1057_v58 = vmul.f32 0.5, %v1055_v47 }
 0x470   : > { %1047 = vadd.xlane.f32.xlu0 %v1046_v37  ;;  %v1227_v46 = vcombine.high %v1223_v32, %v1224_v39  ;;  %v1204_v56 = vrot.slane %v1197_v40, %v1191_v45  ;;  %v1080_v14 = vsel %vm1077_vm0, %v1078_v63, %v1079_v61 }
 0x471   : > { %v1192_v48 = vrot.slane %v1185_v44, %v1191_v45  ;;  %v1074_v62 = vsub.f32 %v1058_v49, %v1070_v50  ;;  %v1073_v8 = vsub.f32 %v1057_v58, %v1069_v57 }
 0x472   : > { %v1234_v55 = vrot.slane %v1227_v46, %v1191_v45 }
 0x473   : > { %v1194_v54 = vsub.f32 %v1158_v43, %v1192_v48  ;;  %v1087_v4 = vmul.f32 %v1083_v16, %v1074_v62  ;;  %v1086_v17 = vmul.f32 %v1080_v14, %v1073_v8 }
 0x475   : > { %v2358_v59 = vmul.f32 %v1234_v55, %v1194_v54  ;;  %v1206_v60 = vmul.f32 %v1204_v56, %v1194_v54  ;;  %v1100_v27 = vcombine.low %v1086_v17, %v1087_v4 }
 0x477   : > { %v1243_v0 = vrot.slane %v2358_v59, %v2207_v13  ;;  %v1247_v1 = vrot.slane %v2358_v59, %v2204_v12  ;;  %v1211_v2 = vrot.slane %v1206_v60, %v2207_v13  ;;  %v1215_v5 = vrot.slane %v1206_v60, %v2204_v12 }
 0x478   : > { %v1102_v34 = vsub.f32 %v367_v28, %v1100_v27 }
 0x479   : > { %v1250_v6 = vsel %vm1077_vm0, %v1243_v0, -inf  ;;  %v1251_v10 = vsel %vm1077_vm0, %v1247_v1, -inf  ;;  %v1218_v22 = vsel %vm1077_vm0, %v1211_v2, 0.0  ;;  %v1219_v23 = vsel %vm1077_vm0, %v1215_v5, 0.0 }
 0x47a   : > { %v1774_v7 = vpop.eup %1773  ;;  %v1252_v19 = vmax.f32 %v1250_v6, %v1251_v10  ;;  %v1220_v18 = vadd.f32 %v1219_v23, %v1218_v22  ;;  %v1103_v32 = vand.u32 2147483647, %v1102_v34 }
 0x47b   : > { %v1089_v29 = vmul.f32 0.6931472, %v1774_v7 }
 0x47c   : > { %v1776_v15 = vpop.eup %1775  ;;  %1253 = vmax.xlane.f32.xlu1 %v1252_v19 }
 0x47d   : > { %v1094_v30 = vsub.f32 %v1089_v29, %v1079_v61  ;;  %v1091_v20 = vmul.f32 0.6931472, %v1776_v15 }
 0x47f   : > { %v1095_v24 = vsub.f32 %v1091_v20, %v1082_v51  ;;  %v1096_v25 = vmul.f32 5.0, %v1094_v30 }
 0x480   : > { %1221 = vadd.xlane.f32.xlu1 %v1220_v18 }
 0x481   : > { %v1097_v26 = vmul.f32 5.0, %v1095_v24 }
 0x483   : > { %v1106_v31 = vcombine.low %v1096_v25, %v1097_v26 }
 0x485   : > { %v1108_v35 = vsub.f32 %v367_v28, %v1106_v31 }
 0x487   : > { %v1109_v36 = vand.u32 2147483647, %v1108_v35 }
 0x489   : > { %v1604_v37 = vrot.slane %v1109_v36, 10 }
 0x48b   : > { %v1114_v38 = vadd.f32 %v1604_v37, %v1103_v32 }
 0x48d   : > { %v1116_v39 = vcombine.high %v1114_v38, %v1114_v38  ;;  %v1119_v40 = vsel %vm1118_vm1, %v1114_v38, 0.0 }
 0x48e   : > { %v1120_v42 = vrot.slane %v1119_v40, 4 }
 0x48f   : > { %v1126_v43 = vsel %vm1118_vm1, %v1116_v39, 0.0 }
 0x490   : > { %v1121_v44 = vadd.f32 %v1120_v42, %v1119_v40  ;;  %v1127_v45 = vrot.slane %v1126_v43, 4 }
 0x492   : > { %v1122_v46 = vrot.slane %v1121_v44, 2  ;;  %v1128_v47 = vadd.f32 %v1127_v45, %v1126_v43 }
 0x494   : > { %v1123_v48 = vadd.f32 %v1122_v46, %v1121_v44  ;;  %v1129_v49 = vrot.slane %v1128_v47, 2 }
 0x496   : > { %v1124_v50 = vrot.slane %v1123_v48, 1  ;;  %v1130_v51 = vadd.f32 %v1129_v49, %v1128_v47 }
 0x498   : > { %v1125_v52 = vadd.f32 %v1124_v50, %v1123_v48  ;;  %v1131_v53 = vrot.slane %v1130_v51, 1 }
 0x49a   : > { %v1132_v54 = vadd.f32 %v1131_v53, %v1130_v51  ;;  %v1133_v55 = vmul.f32 %v2328_v21, %v1125_v52 }
 0x49c   : > { %v1134_v56 = vmul.f32 %v2337_v33, %v1132_v54  ;;  %v1135_v57 = vsel %vm1043_vm12, %v1133_v55, 0.0  ;;  %v1977_v33 = vmov 0.0  }
 0x49e   : > { %v1136_v58 = vsel %vm1043_vm12, %v1134_v56, 0.0 }
 0x49f   : > { %v1137_v60 = vadd.f32 %v1136_v58, %v1135_v57 }
 0x4a1   : > { %1138 = vadd.xlane.f32.xlu0 %v1137_v60 }
 0x4f9   : > { %v2378_v61 = vpop.xlane.xlu0 %1047 }
 0x4fa   : > { %v1237_v62 = vmul.f32 3.0, %v2378_v61 }
 0x4fc   : > { %v2381_v63 = vmin.f32 %v1237_v62, 256.0 }
 0x505   : > { %v1254_v16 = vpop.xlane.xlu1 %1253 }
 0x506   : > { %v1255_v0 = vadd.f32 1.0, %v1254_v16  }
 0x508   : > { %v1973_v21 = vmov %v1255_v0  }
 0x509   : > { %v2383_v1 = vpop.xlane.xlu1 %1221 }
 0x52a   : > { %v2385_v2 = vpop.xlane.xlu0 %1138 }
 0x52b LB: >> { %v1996_v5 = vmov 0   ;;  %v1264_v7 = vadd.f32 %v1975_v21, %v1979_v33  ;;  %v1997_v29 = vmov 269488144   ;;  %v1998_v4 = vmov 0.0   ;;  %s1261_s23 = sadd.s32 1, %s1983_s23   ;;  %s1983_s23 = sphi %s2390_s23, %s1261_s23   ;;  %v1979_v33 = vphi %v1977_v33, %v1978_v33   ;;  %v1975_v21 = vphi %v1973_v21, %v1302_v21  }
 0x52c   : >> { %1777 = vset.pattern.permute.xlu0 %v1996_v5  ;;  %v1271_v6 = vunpack.c.l.s4 %v1997_v29  ;;  %v1298_v18 = vrot.slane %v2381_v63, 4  ;;  %p1258_p7 = scmp.ge.s32.totalorder %s1261_s23, 40  }
 0x52d   : >> { %v1265_v8 = vmul.f32 0.5, %v1264_v7  ;;  %vm1351_vm5 = vcmp.gt.f32.partialorder (%p1258_p7), %v2381_v63, 0.0  ;;  %v1371_v52 = vrot.slane (%p1258_p7), %v2378_v61, %v2242_v41  ;;  %v1377_v53 = vrot.slane (%p1258_p7), %v2385_v2, %v2242_v41  ;;  %p1608_p1 = scmp.ne.s32.totalorder (%p1258_p7), %s1955_s24, 0 }
 0x52e   : >> { %v1272_v10 = vunpack.c.0.s8 %v1271_v6  ;;  %vm1367_vm6 = vcmp.eq.s32.totalorder (%p1258_p7), %v2201_v11, 0  ;;  %vm1373_vm7 = vcmp.eq.s32.totalorder (%p1258_p7), %v2201_v11, 1  ;;  %v1384_v56 = vrot.slane (%p1258_p7), %v2383_v1, %v2207_v13 }
 0x52f   : >> { %1268 = vperm.xlu0 %1777, %v1265_v8   ;;  %v1372_v54 = vsel (%p1258_p7), %vm1367_vm6, %v1371_v52, 0.0  ;;  %v1378_v55 = vsel (%p1258_p7), %vm1373_vm7, %v1377_v53, 0.0  ;;  %vm1380_vm8 = vcmp.eq.s32.totalorder (%p1258_p7), %v2201_v11, 2  ;;  %vm1387_vm9 = vcmp.eq.s32.totalorder (%p1258_p7), %v2201_v11, 3 }
 0x530   : >> { %v1275_v15 = vsub.s32 %v1272_v10, %v2201_v11  ;;  %v1379_v57 = vadd.f32 (%p1258_p7), %v1378_v55, %v1372_v54  ;;  %v1385_v58 = vsel (%p1258_p7), %vm1380_vm8, %v1384_v56, 0.0 }
 0x532   : > { %v1386_v60 = vadd.f32 (%p1258_p7), %v1385_v58, %v1379_v57 }
 0x533   : > { %1778 = vset.pattern.permute.xlu0 (%p1258_p7), %v1990_v3 }
 0x5aa   : >> { %v1269_v14 = vpop.permute.xlu0 %1268 }
 0x5ab   : >> { %v1276_v19 = vrot.slane %v1269_v14, %v1275_v15 }
 0x5ad   : >> { %vm1278_vm2 = vcmp.ge.f32.partialorder %v2358_v59, %v1276_v19 }
 0x5ae   : >> { %v1606_v30 = vsel %vm1278_vm2, 1.0, %v1998_v4 }
 0x5af   : >> { %v1285_v20 = vrot.slane %v1606_v30, %v2207_v13  ;;  %v1289_v22 = vrot.slane %v1606_v30, %v2204_v12 }
 0x5b1   : >> { %v1292_v23 = vsel %vm1077_vm0, %v1285_v20, 0.0  ;;  %v1293_v24 = vsel %vm1077_vm0, %v1289_v22, 0.0 }
 0x5b2   : >> { %v1294_v17 = vadd.f32 %v1293_v24, %v1292_v23 }
 0x5b4   : >> { %1295 = vadd.xlane.f32.xlu0 %v1294_v17 }
 0x63c   : > { %1260 = sbr.rel (!%p1258_p7) target bundleno = 1323 (0x52b), region = 115 }
 0x63d   : >> { %v1296_v25 = vpop.xlane.xlu0 %1295 }
 0x63e   : >> { %vm1300_vm3 = vcmp.ge.f32.partialorder %v1296_v25, %v1298_v18 }
 0x63f   : >> { %v1301_v26 = vsel %vm1300_vm3, %v1265_v8, %v1979_v33   ;;  %v1302_v21 = vsel %vm1300_vm3, %v1975_v21, %v1265_v8  }
 0x640   : >> { %v1978_v33 = vmov %v1301_v26   ;;  %1305 = vperm.xlu0 (%p1258_p7), %1778, %v1301_v26   ;;  %v1356_v45 = vrot.slane (%p1258_p7), %v1301_v26, 4 }
 0x6bb   : > { %v1306_v27 = vpop.permute.xlu0 %1305 }
 0x6bc   : > { %v1313_v28 = vrot.slane %v1306_v27, %v1275_v15 }
 0x6be   : > { %vm1315_vm4 = vcmp.gt.f32.partialorder %v2358_v59, %v1313_v28 }
 0x6bf   : > { %v1607_v31 = vsel %vm1315_vm4, 1.0, %v1993_v9 }
 0x6c0   : > { %v1322_v34 = vrot.slane %v1607_v31, %v2207_v13  ;;  %v1326_v35 = vrot.slane %v1607_v31, %v2204_v12  ;;  %v1334_v36 = vmul.f32 %v1607_v31, %v2358_v59 }
 0x6c2   : > { %v1329_v32 = vsel %vm1077_vm0, %v1322_v34, 0.0  ;;  %v1330_v37 = vsel %vm1077_vm0, %v1326_v35, 0.0  ;;  %v1339_v38 = vrot.slane %v1334_v36, %v2207_v13  ;;  %v1343_v3 = vrot.slane %v1334_v36, %v2204_v12 }
 0x6c3   : > { %v1331_v39 = vadd.f32 %v1330_v37, %v1329_v32 }
 0x6c4   : > { %v1346_v40 = vsel %vm1077_vm0, %v1339_v38, 0.0  ;;  %v1347_v42 = vsel %vm1077_vm0, %v1343_v3, 0.0 }
 0x6c5   : > { %1332 = vadd.xlane.f32.xlu0 %v1331_v39  ;;  %v1348_v9 = vadd.f32 %v1347_v42, %v1346_v40 }
 0x6c7   : > { %1349 = vadd.xlane.f32.xlu1 %v1348_v9 }
 0x74e   : > { %v1333_v43 = vpop.xlane.xlu0 %1332 }
 0x74f   : > { %v1353_v44 = vrot.slane %v1333_v43, 4 }
 0x750   : > { %v1350_v48 = vpop.xlane.xlu1 %1349 }
 0x751   : > { %v1355_v59 = vsub.f32 %v2381_v63, %v1353_v44 }
 0x753   : > { %v1358_v46 = vmul.f32 %v1356_v45, %v1355_v59 }
 0x755   : > { %v1360_v47 = vrot.slane %v1358_v46, 4 }
 0x757   : > { %v1362_v49 = vadd.f32 %v1360_v47, %v1350_v48 }
 0x759   : > { %v1364_v12 = vrot.slane %v1362_v49, 4 }
 0x75b   : > { %v1366_v50 = vsel %vm1351_vm5, %v1364_v12, 0.0 }
 0x75c   : > { %v1389_v51 = vrot.slane %v1366_v50, 4 }
 0x75e   : > { %1613 = vpush %v1389_v51 }
 0x78e   : > { %1398 = sbr.rel (%p1608_p1) target bundleno = 1941 (0x795), region = 59 }
 0x78f   : > { %s1614_s27 = spop %1613 }
 0x790   : > { %v1391_v61 = vstv %s1614_s27 }
 0x791   : > { %v1393_v62 = vsel %vm1387_vm9, %v1391_v61, 0.0 }
 0x792   : > { %v1394_v41 = vadd.f32 %v1393_v62, %v1386_v60 }
 0x793   : > { %v1999_v63 = vmov 0.0  }
 0x794   : > { %1399 = vst [vmem:[%s2388_s17] sm:$0xff] %v1999_v63 }
 0x795 PF: > { %s1610_s7 = sshll.u32 %s1959_s25, 7  ;;  %s1417_s24 = sshll.u32 %s2388_s17, 4  ;;  %s1418_s24 = int_to_ptr.vmem [resolvable:$true] %s1417_s24 }
 0x796   : > { %s2436_s16 = scalar_lea.hbm %s2500_s5, %s1610_s7  ;;  %s1404_s26 = scalar_lea.sflag [#allocation4], %s342_s11 }
 0x797   : > { %s1835_s3 = scalar_lea.vmem %s1418_s24, 128  ;;  %s2000_s6 = smov [#allocation7]  }
 0x798   : > { %p1836_p9 = scmp.ne.s32.totalorder %s1418_s24, %s1835_s3  ;;  %s1839_s9 = sshll.u32 %s2000_s6, 4  ;;  %s1840_s9 = int_to_ptr.vmem [resolvable:$false] %s1839_s9 }
 0x799   : > { %s1841_s25 = scalar_lea.vmem %s1840_s9, 256  ;;  %p1842_p11 = scmp.lt.s32.totalorder %s1418_s24, %s1840_s9 }
 0x79a   : > { %p1837_p10 = pnand %p1836_p9, %p2113_p12  ;;  %p1843_p5 = scmp.lt.s32.totalorder %s1841_s25, %s1835_s3 }
 0x79b   : > { %v1400_v13 = vld [vmem:[%s2388_s17] sm:$0xff] }
 0x79c   : > { %v1401_v11 = vadd.f32 %v1400_v13, %v1394_v41  ;;  %p1838_p3 = pneg %p1837_p10  ;;  %p1844_p6 = por %p1843_p5, %p1842_p11 }
 0x79e   : > { %1402 = vst [vmem:[%s2388_s17] sm:$0xff] %v1401_v11  ;;  %p1845_p13 = pnand %p1844_p6, %p1838_p3 }
 0x7a0   : > { %1848 = shalt.err (!%p1845_p13)
}
 0x7a1   : > { %s1849_s12 = scalar_lea.hbm %s2436_s16, 128  ;;  %s1853_s10 = scalar_lea.hbm %s2500_s5, 512 }
 0x7a2   : > { %p1850_p0 = scmp.ne.s32.totalorder %s2436_s16, %s1849_s12  ;;  %p1854_p7 = scmp.lt.s32.totalorder %s2436_s16, %s2500_s5 }
 0x7a3   : > { %p1855_p1 = scmp.lt.s32.totalorder %s1853_s10, %s1849_s12 }
 0x7a4   : > { %p1851_p4 = pnand %p1850_p0, %p2113_p12 }
 0x7a5   : > { %p1856_p9 = por %p1855_p1, %p1854_p7 }
 0x7a6   : > { %p1852_p8 = pneg %p1851_p4 }
 0x7a8   : > { %p1857_p10 = pnand %p1856_p9, %p1852_p8 }
 0x7aa   : > { %1860 = shalt.err (!%p1857_p10)
}
 0x7ab   : > { %1619 = dma.vmem_to_hbm [thread:$0]  (%p2113_p12), %s1418_s24, 128, %s2436_s16, %s1404_s26  }
 0x7ac PF: > { %p1633_p3 = scmp.ge.s32.totalorder %s1971_s28, 2  ;;  %s1429_s17 = sand.u32 1, %s1931_s18  }
 0x7ad   : > { %s1430_s23 = scalar_lea.sflag [#allocation4], %s1429_s17 }
 0x7ae   : > { %p1629_p11 = pnand %p1633_p3, %p2126_p2 }
 0x7b0   : > { %p1630_p5 = pneg %p1629_p11 }
 0x7b2   : > { %1926 = dma.done.wait (%p1630_p5), %s1430_s23, 128  }
 0x7b3   : > { %1928 = vsyncadd (%p1630_p5), %s1430_s23, 4294967168  ;;  %s24_s28 = sadd.s32 1, %s1971_s28   ;;  %s2521_s15 = sld [smem:[#allocation16_spill]] }
 0x7b4   : > { %p21_p6 = scmp.ge.s32.totalorder %s24_s28, 10   ;;  %s2522_s27 = sld [smem:[#allocation11_spill]] }
 0x7b5   : > { %s2523_s23 = sld [smem:[#allocation17_spill]]  ;;  %s2528_s18 = smov %s1935_s19 }
 0x7b6   : > { %s2524_s24 = sld [smem:[#allocation12_spill]]  ;;  %s2529_s19 = smov %s1939_s20 }
 0x7b7   : > { %s2525_s25 = sld [smem:[#allocation13_spill]]  ;;  %s2531_s21 = smov %s1947_s22 }
 0x7b8   : > { %s2526_s26 = sld [smem:[#allocation14_spill]] }
 0x7b9   : > { %s2527_s7 = sld [smem:[#allocation15_spill]]  ;;  %s2530_s20 = smov %s2521_s15 }
 0x7ba   : > { %s2532_s22 = smov %s2522_s27 }
 0x7bb   :  { %23 = sbr.rel (!%p21_p6) target bundleno = 13 (0xd), region = 126 }
 0x7bf   : > { %s2533_s27 = smov %s2527_s7 }
 0x7c0   :  { %1435 = vsyncpa [#allocation3], 1 }
 0x7c1   :  { %1437 = vsyncpa [#allocation3 + $0x1], 1 }
 0x7c2   :  { %1438 = vsyncpa [#allocation6], 1 }
 0x7c3   :  { %1440 = vsyncpa [#allocation6 + $0x1], 1 }
 0x7c4   :  { %1441 = vsyncpa [#allocation4], 1 }
 0x7c5   :  { %1443 = vsyncpa [#allocation4 + $0x1], 1 }

</bundles_post_ra>
